<compile_context>
chip_gen: v7x
topology: tpu7x:2x2x1
jax: 0.10.0
libtpu: 0.0.40
codegen_flags: <defaults>
</compile_context>

<pallas_src>
import functools

import jax
import jax.numpy as jnp
from jax.experimental import pallas as pl
from jax.experimental.pallas import tpu as pltpu


GRID_SIZE = 5
SPLINE_ORDER = 3
GRID_RANGE = (-1.0, 1.0)
NUM_BASES = GRID_SIZE + SPLINE_ORDER          # G


# ----------------------------------------------------------------------------
# In-kernel KAN feature construction (traced inside the Pallas kernel)
# ----------------------------------------------------------------------------
def _kan_features(x, *, grid_size, spline_order, grid_range):
    """Return concat([SiLU(x), B_0(x), ..., B_{G-1}(x)], axis=-1).

    x: (N, in_f) float32.  The knot grid is uniform and identical across
    channels, so knot values and Cox-de-Boor denominators are compile-time
    Python constants (no VMEM grid tensor, no divides in the recursion).
    """
    h = (grid_range[1] - grid_range[0]) / grid_size
    n_knots = grid_size + 2 * spline_order + 1
    knots = [grid_range[0] + (j - spline_order) * h for j in range(n_knots)]

    # SiLU(x) = x * sigmoid(x), numerically stable (single exp on the EUP).
    z = jnp.exp(-jnp.abs(x))
    inv = 1.0 / (1.0 + z)
    sig = jnp.where(x >= 0.0, inv, z * inv)
    silu = x * sig

    # Order-0 bases: indicator of the half-open interval [knots[j], knots[j+1])
    # (matches efficient-KAN; x exactly at the rightmost knot gets no spline
    # contribution).
    bases = [
        jnp.where((x >= knots[j]) & (x < knots[j + 1]), 1.0, 0.0).astype(jnp.float32)
        for j in range(n_knots - 1)
    ]

    # Cox-de-Boor recursion; uniform grid => denominators are k*h constants.
    for k in range(1, spline_order + 1):
        inv_kh = 1.0 / (k * h)
        bases = [
            (x - knots[j]) * inv_kh * bases[j]
            + (knots[j + k + 1] - x) * inv_kh * bases[j + 1]
            for j in range(n_knots - 1 - k)
        ]

    # (N, (G+1)*in_f)
    return jnp.concatenate([silu] + bases, axis=1)


# ----------------------------------------------------------------------------
# Pallas kernel: one whole up-sampling scale, fused
#   out = residual + KAN2(KAN1(x))
# ----------------------------------------------------------------------------
def fused_scale_kernel(x_ref, res_ref, w1_ref, w2_ref, o_ref, *,
                       grid_size, spline_order, grid_range):
    # x_ref  : (tile_n, in1)
    # res_ref: (tile_n, out1)
    # w1_ref : ((G+1)*in1,  out1)   packed [base; spline_0; ...; spline_{G-1}]
    # w2_ref : ((G+1)*out1, out1)
    # o_ref  : (tile_n, out1)
    x = x_ref[...].astype(jnp.float32)

    feat1 = _kan_features(x, grid_size=grid_size, spline_order=spline_order,
                          grid_range=grid_range)
    hmid = jnp.dot(feat1, w1_ref[...], preferred_element_type=jnp.float32)

    feat2 = _kan_features(hmid, grid_size=grid_size, spline_order=spline_order,
                          grid_range=grid_range)
    y = jnp.dot(feat2, w2_ref[...], preferred_element_type=jnp.float32)

    o_ref[...] = (res_ref[...].astype(jnp.float32) + y).astype(o_ref.dtype)


def fused_scale_apply(x2d, res2d, w1, w2):
    """out = res2d + KAN2(KAN1(x2d)); x2d: (N, in1), res2d: (N, out1)."""
    N, in_f = x2d.shape
    out_f = w1.shape[1]

    # Row tile: single block at small N; multiple-of-8 tile + parallel grid
    # axis (megacore sharding on v7x, pipelined DMA) at production N.
    tile_n = N if N <= 512 else 512
    grid_n = pl.cdiv(N, tile_n)

    kernel = functools.partial(
        fused_scale_kernel,
        grid_size=GRID_SIZE, spline_order=SPLINE_ORDER, grid_range=GRID_RANGE)

    return pl.pallas_call(
        kernel,
        out_shape=jax.ShapeDtypeStruct((N, out_f), jnp.float32),
        grid_spec=pltpu.PrefetchScalarGridSpec(
            num_scalar_prefetch=0,
            grid=(grid_n,),
            in_specs=[
                pl.BlockSpec((tile_n, in_f), lambda i: (i, 0)),
                pl.BlockSpec((tile_n, out_f), lambda i: (i, 0)),
                pl.BlockSpec(w1.shape, lambda i: (0, 0)),
                pl.BlockSpec(w2.shape, lambda i: (0, 0)),
            ],
            out_specs=pl.BlockSpec((tile_n, out_f), lambda i: (i, 0)),
        ),
        compiler_params=pltpu.CompilerParams(
            dimension_semantics=("parallel",)),
    )(x2d, res2d, w1, w2)


# ----------------------------------------------------------------------------
# Parameter construction (deterministic; shapes mirror KANLinear.__init__).
# The base weight and the scaled spline weights are packed into a single
# ((G+1)*in, out) matrix matching the feature concat order in the kernel.
# ----------------------------------------------------------------------------
def init_kan_packed_weight(key, in_f, out_f,
                           grid_size=GRID_SIZE, spline_order=SPLINE_ORDER):
    G = grid_size + spline_order
    k1, k2, k3 = jax.random.split(key, 3)
    bound = (1.0 / in_f) ** 0.5
    base_w = jax.random.uniform(k1, (out_f, in_f), jnp.float32, -bound, bound)
    spline_w = jax.random.uniform(k2, (out_f, in_f, G), jnp.float32, -0.1, 0.1)
    spline_scaler = jax.random.uniform(k3, (out_f, in_f), jnp.float32,
                                       -bound, bound)
    scaled = spline_w * spline_scaler[:, :, None]               # (out, in, G)

    w_base_t = base_w.T                                         # (in, out)
    w_spline_t = jnp.transpose(scaled, (2, 1, 0)).reshape(G * in_f, out_f)
    return jnp.concatenate([w_base_t, w_spline_t], axis=0)      # ((G+1)*in, out)


def init_multi_scale_trend_mixing(key, seq_len, down_sampling_window,
                                  down_sampling_layers):
    """Mirrors the ModuleList construction in MultiScaleTrendMixing.__init__."""
    layer_params = []
    keys = jax.random.split(key, 2 * down_sampling_layers)
    ki = 0
    for i in reversed(range(down_sampling_layers)):
        in_f = seq_len // down_sampling_window ** (i + 1)
        out_f = seq_len // down_sampling_window ** i
        w1 = init_kan_packed_weight(keys[ki], in_f, out_f); ki += 1
        w2 = init_kan_packed_weight(keys[ki], out_f, out_f); ki += 1
        layer_params.append((w1, w2))
    return layer_params


# ----------------------------------------------------------------------------
# Forward pass (same control flow as the PyTorch module; the Sequential of two
# KANLinears plus the residual add is ONE fused pallas_call per scale).
# ----------------------------------------------------------------------------
def multi_scale_trend_mixing(trend_list, layer_params):
    trend_list_reverse = list(trend_list)
    trend_list_reverse.reverse()
    out_low = trend_list_reverse[0]
    out_high = trend_list_reverse[1]
    out_trend_list = [out_low]
    for i in range(len(trend_list_reverse) - 1):
        w1, w2 = layer_params[i]
        B, C, L_in = out_low.shape
        L_out = out_high.shape[-1]
        # fused: out_high + KAN2(KAN1(out_low))
        fused = fused_scale_apply(
            out_low.reshape(B * C, L_in),
            out_high.reshape(B * C, L_out),
            w1, w2,
        ).reshape(B, C, L_out)
        out_low = fused
        if i + 2 <= len(trend_list_reverse) - 1:
            out_high = trend_list_reverse[i + 2]
        out_trend_list.append(out_low)
    out_trend_list.reverse()
    return out_trend_list


# ----------------------------------------------------------------------------
# Demo
# ----------------------------------------------------------------------------
if __name__ == "__main__":
    # configs: seq_len=16, down_sampling_window=2, down_sampling_layers=2
    seq_len = 16
    down_sampling_window = 2
    down_sampling_layers = 2
    B, C = 2, 4  # batch, d_model channels

    key = jax.random.PRNGKey(0)
    kp, kx = jax.random.split(key)

    layer_params = init_multi_scale_trend_mixing(
        kp, seq_len, down_sampling_window, down_sampling_layers)

    # trend_list[i]: (B, C, seq_len // dsw^i), coarsest scale last
    trend_list = []
    xkeys = jax.random.split(kx, down_sampling_layers + 1)
    for i in range(down_sampling_layers + 1):
        L_i = seq_len // down_sampling_window ** i
        trend_list.append(
            jax.random.normal(xkeys[i], (B, C, L_i), dtype=jnp.float32))

    out_list = multi_scale_trend_mixing(trend_list, layer_params)
    for o in out_list:
        jax.block_until_ready(o)

    # sanity: output shapes match input shapes
    assert all(o.shape == x.shape for o, x in zip(out_list, trend_list))
    print("KERNEL_OK")
</pallas_src>

<mosaic_0001>
module attributes {stable_mosaic.version = 11 : i64} {
  func.func @fused_scale_kernel(%arg0: i32, %arg1: memref<8x4xf32, #tpu.memory_space<vmem>>, %arg2: memref<8x8xf32, #tpu.memory_space<vmem>>, %arg3: memref<36x8xf32, #tpu.memory_space<vmem>>, %arg4: memref<72x8xf32, #tpu.memory_space<vmem>>, %arg5: memref<8x8xf32, #tpu.memory_space<vmem>>) attributes {dimension_semantics = [#tpu.dimension_semantics<parallel>], iteration_bounds = array<i64: 1>, scalar_prefetch = 0 : i64, scratch_operands = 0 : i64, tpu.core_type = #tpu.core_type<tc>, window_params = [{transform_indices = @transform_0, window_bounds = array<i64: 8, 4>}, {transform_indices = @transform_1, window_bounds = array<i64: 8, 8>}, {pipeline_mode = #tpu.pipeline_mode<synchronous>, transform_indices = @transform_2, window_bounds = array<i64: 36, 8>}, {pipeline_mode = #tpu.pipeline_mode<synchronous>, transform_indices = @transform_3, window_bounds = array<i64: 72, 8>}, {transform_indices = @transform_4, window_bounds = array<i64: 8, 8>}]} {
    %c0 = arith.constant 0 : index
    %c0_0 = arith.constant 0 : index
    %0 = vector.load %arg1[%c0, %c0_0] : memref<8x4xf32, #tpu.memory_space<vmem>>, vector<8x4xf32>
    %1 = math.absf %0 : vector<8x4xf32>
    %cst = arith.constant 0.000000e+00 : f32
    %2 = vector.broadcast %cst : f32 to vector<8x4xf32>
    %3 = arith.subf %2, %1 : vector<8x4xf32>
    %4 = math.exp %3 : vector<8x4xf32>
    %cst_1 = arith.constant 1.000000e+00 : f32
    %5 = vector.broadcast %cst_1 : f32 to vector<8x4xf32>
    %6 = arith.addf %5, %4 : vector<8x4xf32>
    %cst_2 = arith.constant 1.000000e+00 : f32
    %7 = vector.broadcast %cst_2 : f32 to vector<8x4xf32>
    %8 = arith.divf %7, %6 : vector<8x4xf32>
    %cst_3 = arith.constant 0.000000e+00 : f32
    %9 = vector.broadcast %cst_3 : f32 to vector<8x4xf32>
    %10 = arith.cmpf oge, %0, %9 : vector<8x4xf32>
    %11 = arith.mulf %4, %8 : vector<8x4xf32>
    %12 = arith.select %10, %8, %11 : vector<8x4xi1>, vector<8x4xf32>
    %13 = arith.mulf %0, %12 : vector<8x4xf32>
    %cst_4 = arith.constant -2.200000e+00 : f32
    %14 = vector.broadcast %cst_4 : f32 to vector<8x4xf32>
    %15 = arith.cmpf oge, %0, %14 : vector<8x4xf32>
    %cst_5 = arith.constant -1.800000e+00 : f32
    %16 = vector.broadcast %cst_5 : f32 to vector<8x4xf32>
    %17 = arith.cmpf olt, %0, %16 : vector<8x4xf32>
    %18 = arith.andi %15, %17 : vector<8x4xi1>
    %cst_6 = arith.constant 1.000000e+00 : f32
    %cst_7 = arith.constant 0.000000e+00 : f32
    %19 = vector.broadcast %cst_6 : f32 to vector<8x4xf32>
    %20 = vector.broadcast %cst_7 : f32 to vector<8x4xf32>
    %21 = arith.select %18, %19, %20 : vector<8x4xi1>, vector<8x4xf32>
    %cst_8 = arith.constant -1.800000e+00 : f32
    %22 = vector.broadcast %cst_8 : f32 to vector<8x4xf32>
    %23 = arith.cmpf oge, %0, %22 : vector<8x4xf32>
    %cst_9 = arith.constant -1.400000e+00 : f32
    %24 = vector.broadcast %cst_9 : f32 to vector<8x4xf32>
    %25 = arith.cmpf olt, %0, %24 : vector<8x4xf32>
    %26 = arith.andi %23, %25 : vector<8x4xi1>
    %cst_10 = arith.constant 1.000000e+00 : f32
    %cst_11 = arith.constant 0.000000e+00 : f32
    %27 = vector.broadcast %cst_10 : f32 to vector<8x4xf32>
    %28 = vector.broadcast %cst_11 : f32 to vector<8x4xf32>
    %29 = arith.select %26, %27, %28 : vector<8x4xi1>, vector<8x4xf32>
    %cst_12 = arith.constant -1.400000e+00 : f32
    %30 = vector.broadcast %cst_12 : f32 to vector<8x4xf32>
    %31 = arith.cmpf oge, %0, %30 : vector<8x4xf32>
    %cst_13 = arith.constant -1.000000e+00 : f32
    %32 = vector.broadcast %cst_13 : f32 to vector<8x4xf32>
    %33 = arith.cmpf olt, %0, %32 : vector<8x4xf32>
    %34 = arith.andi %31, %33 : vector<8x4xi1>
    %cst_14 = arith.constant 1.000000e+00 : f32
    %cst_15 = arith.constant 0.000000e+00 : f32
    %35 = vector.broadcast %cst_14 : f32 to vector<8x4xf32>
    %36 = vector.broadcast %cst_15 : f32 to vector<8x4xf32>
    %37 = arith.select %34, %35, %36 : vector<8x4xi1>, vector<8x4xf32>
    %cst_16 = arith.constant -1.000000e+00 : f32
    %38 = vector.broadcast %cst_16 : f32 to vector<8x4xf32>
    %39 = arith.cmpf oge, %0, %38 : vector<8x4xf32>
    %cst_17 = arith.constant -6.000000e-01 : f32
    %40 = vector.broadcast %cst_17 : f32 to vector<8x4xf32>
    %41 = arith.cmpf olt, %0, %40 : vector<8x4xf32>
    %42 = arith.andi %39, %41 : vector<8x4xi1>
    %cst_18 = arith.constant 1.000000e+00 : f32
    %cst_19 = arith.constant 0.000000e+00 : f32
    %43 = vector.broadcast %cst_18 : f32 to vector<8x4xf32>
    %44 = vector.broadcast %cst_19 : f32 to vector<8x4xf32>
    %45 = arith.select %42, %43, %44 : vector<8x4xi1>, vector<8x4xf32>
    %cst_20 = arith.constant -6.000000e-01 : f32
    %46 = vector.broadcast %cst_20 : f32 to vector<8x4xf32>
    %47 = arith.cmpf oge, %0, %46 : vector<8x4xf32>
    %cst_21 = arith.constant -2.000000e-01 : f32
    %48 = vector.broadcast %cst_21 : f32 to vector<8x4xf32>
    %49 = arith.cmpf olt, %0, %48 : vector<8x4xf32>
    %50 = arith.andi %47, %49 : vector<8x4xi1>
    %cst_22 = arith.constant 1.000000e+00 : f32
    %cst_23 = arith.constant 0.000000e+00 : f32
    %51 = vector.broadcast %cst_22 : f32 to vector<8x4xf32>
    %52 = vector.broadcast %cst_23 : f32 to vector<8x4xf32>
    %53 = arith.select %50, %51, %52 : vector<8x4xi1>, vector<8x4xf32>
    %cst_24 = arith.constant -2.000000e-01 : f32
    %54 = vector.broadcast %cst_24 : f32 to vector<8x4xf32>
    %55 = arith.cmpf oge, %0, %54 : vector<8x4xf32>
    %cst_25 = arith.constant 2.000000e-01 : f32
    %56 = vector.broadcast %cst_25 : f32 to vector<8x4xf32>
    %57 = arith.cmpf olt, %0, %56 : vector<8x4xf32>
    %58 = arith.andi %55, %57 : vector<8x4xi1>
    %cst_26 = arith.constant 1.000000e+00 : f32
    %cst_27 = arith.constant 0.000000e+00 : f32
    %59 = vector.broadcast %cst_26 : f32 to vector<8x4xf32>
    %60 = vector.broadcast %cst_27 : f32 to vector<8x4xf32>
    %61 = arith.select %58, %59, %60 : vector<8x4xi1>, vector<8x4xf32>
    %cst_28 = arith.constant 2.000000e-01 : f32
    %62 = vector.broadcast %cst_28 : f32 to vector<8x4xf32>
    %63 = arith.cmpf oge, %0, %62 : vector<8x4xf32>
    %cst_29 = arith.constant 6.000000e-01 : f32
    %64 = vector.broadcast %cst_29 : f32 to vector<8x4xf32>
    %65 = arith.cmpf olt, %0, %64 : vector<8x4xf32>
    %66 = arith.andi %63, %65 : vector<8x4xi1>
    %cst_30 = arith.constant 1.000000e+00 : f32
    %cst_31 = arith.constant 0.000000e+00 : f32
    %67 = vector.broadcast %cst_30 : f32 to vector<8x4xf32>
    %68 = vector.broadcast %cst_31 : f32 to vector<8x4xf32>
    %69 = arith.select %66, %67, %68 : vector<8x4xi1>, vector<8x4xf32>
    %cst_32 = arith.constant 6.000000e-01 : f32
    %70 = vector.broadcast %cst_32 : f32 to vector<8x4xf32>
    %71 = arith.cmpf oge, %0, %70 : vector<8x4xf32>
    %cst_33 = arith.constant 1.000000e+00 : f32
    %72 = vector.broadcast %cst_33 : f32 to vector<8x4xf32>
    %73 = arith.cmpf olt, %0, %72 : vector<8x4xf32>
    %74 = arith.andi %71, %73 : vector<8x4xi1>
    %cst_34 = arith.constant 1.000000e+00 : f32
    %cst_35 = arith.constant 0.000000e+00 : f32
    %75 = vector.broadcast %cst_34 : f32 to vector<8x4xf32>
    %76 = vector.broadcast %cst_35 : f32 to vector<8x4xf32>
    %77 = arith.select %74, %75, %76 : vector<8x4xi1>, vector<8x4xf32>
    %cst_36 = arith.constant 1.000000e+00 : f32
    %78 = vector.broadcast %cst_36 : f32 to vector<8x4xf32>
    %79 = arith.cmpf oge, %0, %78 : vector<8x4xf32>
    %cst_37 = arith.constant 1.400000e+00 : f32
    %80 = vector.broadcast %cst_37 : f32 to vector<8x4xf32>
    %81 = arith.cmpf olt, %0, %80 : vector<8x4xf32>
    %82 = arith.andi %79, %81 : vector<8x4xi1>
    %cst_38 = arith.constant 1.000000e+00 : f32
    %cst_39 = arith.constant 0.000000e+00 : f32
    %83 = vector.broadcast %cst_38 : f32 to vector<8x4xf32>
    %84 = vector.broadcast %cst_39 : f32 to vector<8x4xf32>
    %85 = arith.select %82, %83, %84 : vector<8x4xi1>, vector<8x4xf32>
    %cst_40 = arith.constant 1.400000e+00 : f32
    %86 = vector.broadcast %cst_40 : f32 to vector<8x4xf32>
    %87 = arith.cmpf oge, %0, %86 : vector<8x4xf32>
    %cst_41 = arith.constant 1.800000e+00 : f32
    %88 = vector.broadcast %cst_41 : f32 to vector<8x4xf32>
    %89 = arith.cmpf olt, %0, %88 : vector<8x4xf32>
    %90 = arith.andi %87, %89 : vector<8x4xi1>
    %cst_42 = arith.constant 1.000000e+00 : f32
    %cst_43 = arith.constant 0.000000e+00 : f32
    %91 = vector.broadcast %cst_42 : f32 to vector<8x4xf32>
    %92 = vector.broadcast %cst_43 : f32 to vector<8x4xf32>
    %93 = arith.select %90, %91, %92 : vector<8x4xi1>, vector<8x4xf32>
    %cst_44 = arith.constant 1.800000e+00 : f32
    %94 = vector.broadcast %cst_44 : f32 to vector<8x4xf32>
    %95 = arith.cmpf oge, %0, %94 : vector<8x4xf32>
    %cst_45 = arith.constant 2.200000e+00 : f32
    %96 = vector.broadcast %cst_45 : f32 to vector<8x4xf32>
    %97 = arith.cmpf olt, %0, %96 : vector<8x4xf32>
    %98 = arith.andi %95, %97 : vector<8x4xi1>
    %cst_46 = arith.constant 1.000000e+00 : f32
    %cst_47 = arith.constant 0.000000e+00 : f32
    %99 = vector.broadcast %cst_46 : f32 to vector<8x4xf32>
    %100 = vector.broadcast %cst_47 : f32 to vector<8x4xf32>
    %101 = arith.select %98, %99, %100 : vector<8x4xi1>, vector<8x4xf32>
    %cst_48 = arith.constant -2.200000e+00 : f32
    %102 = vector.broadcast %cst_48 : f32 to vector<8x4xf32>
    %103 = arith.subf %0, %102 : vector<8x4xf32>
    %cst_49 = arith.constant 2.500000e+00 : f32
    %104 = vector.broadcast %cst_49 : f32 to vector<8x4xf32>
    %105 = arith.mulf %103, %104 : vector<8x4xf32>
    %106 = arith.mulf %105, %21 : vector<8x4xf32>
    %cst_50 = arith.constant -1.400000e+00 : f32
    %107 = vector.broadcast %cst_50 : f32 to vector<8x4xf32>
    %108 = arith.subf %107, %0 : vector<8x4xf32>
    %cst_51 = arith.constant 2.500000e+00 : f32
    %109 = vector.broadcast %cst_51 : f32 to vector<8x4xf32>
    %110 = arith.mulf %108, %109 : vector<8x4xf32>
    %111 = arith.mulf %110, %29 : vector<8x4xf32>
    %112 = arith.addf %106, %111 : vector<8x4xf32>
    %cst_52 = arith.constant -1.800000e+00 : f32
    %113 = vector.broadcast %cst_52 : f32 to vector<8x4xf32>
    %114 = arith.subf %0, %113 : vector<8x4xf32>
    %cst_53 = arith.constant 2.500000e+00 : f32
    %115 = vector.broadcast %cst_53 : f32 to vector<8x4xf32>
    %116 = arith.mulf %114, %115 : vector<8x4xf32>
    %117 = arith.mulf %116, %29 : vector<8x4xf32>
    %cst_54 = arith.constant -1.000000e+00 : f32
    %118 = vector.broadcast %cst_54 : f32 to vector<8x4xf32>
    %119 = arith.subf %118, %0 : vector<8x4xf32>
    %cst_55 = arith.constant 2.500000e+00 : f32
    %120 = vector.broadcast %cst_55 : f32 to vector<8x4xf32>
    %121 = arith.mulf %119, %120 : vector<8x4xf32>
    %122 = arith.mulf %121, %37 : vector<8x4xf32>
    %123 = arith.addf %117, %122 : vector<8x4xf32>
    %cst_56 = arith.constant -1.400000e+00 : f32
    %124 = vector.broadcast %cst_56 : f32 to vector<8x4xf32>
    %125 = arith.subf %0, %124 : vector<8x4xf32>
    %cst_57 = arith.constant 2.500000e+00 : f32
    %126 = vector.broadcast %cst_57 : f32 to vector<8x4xf32>
    %127 = arith.mulf %125, %126 : vector<8x4xf32>
    %128 = arith.mulf %127, %37 : vector<8x4xf32>
    %cst_58 = arith.constant -6.000000e-01 : f32
    %129 = vector.broadcast %cst_58 : f32 to vector<8x4xf32>
    %130 = arith.subf %129, %0 : vector<8x4xf32>
    %cst_59 = arith.constant 2.500000e+00 : f32
    %131 = vector.broadcast %cst_59 : f32 to vector<8x4xf32>
    %132 = arith.mulf %130, %131 : vector<8x4xf32>
    %133 = arith.mulf %132, %45 : vector<8x4xf32>
    %134 = arith.addf %128, %133 : vector<8x4xf32>
    %cst_60 = arith.constant -1.000000e+00 : f32
    %135 = vector.broadcast %cst_60 : f32 to vector<8x4xf32>
    %136 = arith.subf %0, %135 : vector<8x4xf32>
    %cst_61 = arith.constant 2.500000e+00 : f32
    %137 = vector.broadcast %cst_61 : f32 to vector<8x4xf32>
    %138 = arith.mulf %136, %137 : vector<8x4xf32>
    %139 = arith.mulf %138, %45 : vector<8x4xf32>
    %cst_62 = arith.constant -2.000000e-01 : f32
    %140 = vector.broadcast %cst_62 : f32 to vector<8x4xf32>
    %141 = arith.subf %140, %0 : vector<8x4xf32>
    %cst_63 = arith.constant 2.500000e+00 : f32
    %142 = vector.broadcast %cst_63 : f32 to vector<8x4xf32>
    %143 = arith.mulf %141, %142 : vector<8x4xf32>
    %144 = arith.mulf %143, %53 : vector<8x4xf32>
    %145 = arith.addf %139, %144 : vector<8x4xf32>
    %cst_64 = arith.constant -6.000000e-01 : f32
    %146 = vector.broadcast %cst_64 : f32 to vector<8x4xf32>
    %147 = arith.subf %0, %146 : vector<8x4xf32>
    %cst_65 = arith.constant 2.500000e+00 : f32
    %148 = vector.broadcast %cst_65 : f32 to vector<8x4xf32>
    %149 = arith.mulf %147, %148 : vector<8x4xf32>
    %150 = arith.mulf %149, %53 : vector<8x4xf32>
    %cst_66 = arith.constant 2.000000e-01 : f32
    %151 = vector.broadcast %cst_66 : f32 to vector<8x4xf32>
    %152 = arith.subf %151, %0 : vector<8x4xf32>
    %cst_67 = arith.constant 2.500000e+00 : f32
    %153 = vector.broadcast %cst_67 : f32 to vector<8x4xf32>
    %154 = arith.mulf %152, %153 : vector<8x4xf32>
    %155 = arith.mulf %154, %61 : vector<8x4xf32>
    %156 = arith.addf %150, %155 : vector<8x4xf32>
    %cst_68 = arith.constant -2.000000e-01 : f32
    %157 = vector.broadcast %cst_68 : f32 to vector<8x4xf32>
    %158 = arith.subf %0, %157 : vector<8x4xf32>
    %cst_69 = arith.constant 2.500000e+00 : f32
    %159 = vector.broadcast %cst_69 : f32 to vector<8x4xf32>
    %160 = arith.mulf %158, %159 : vector<8x4xf32>
    %161 = arith.mulf %160, %61 : vector<8x4xf32>
    %cst_70 = arith.constant 6.000000e-01 : f32
    %162 = vector.broadcast %cst_70 : f32 to vector<8x4xf32>
    %163 = arith.subf %162, %0 : vector<8x4xf32>
    %cst_71 = arith.constant 2.500000e+00 : f32
    %164 = vector.broadcast %cst_71 : f32 to vector<8x4xf32>
    %165 = arith.mulf %163, %164 : vector<8x4xf32>
    %166 = arith.mulf %165, %69 : vector<8x4xf32>
    %167 = arith.addf %161, %166 : vector<8x4xf32>
    %cst_72 = arith.constant 2.000000e-01 : f32
    %168 = vector.broadcast %cst_72 : f32 to vector<8x4xf32>
    %169 = arith.subf %0, %168 : vector<8x4xf32>
    %cst_73 = arith.constant 2.500000e+00 : f32
    %170 = vector.broadcast %cst_73 : f32 to vector<8x4xf32>
    %171 = arith.mulf %169, %170 : vector<8x4xf32>
    %172 = arith.mulf %171, %69 : vector<8x4xf32>
    %cst_74 = arith.constant 1.000000e+00 : f32
    %173 = vector.broadcast %cst_74 : f32 to vector<8x4xf32>
    %174 = arith.subf %173, %0 : vector<8x4xf32>
    %cst_75 = arith.constant 2.500000e+00 : f32
    %175 = vector.broadcast %cst_75 : f32 to vector<8x4xf32>
    %176 = arith.mulf %174, %175 : vector<8x4xf32>
    %177 = arith.mulf %176, %77 : vector<8x4xf32>
    %178 = arith.addf %172, %177 : vector<8x4xf32>
    %cst_76 = arith.constant 6.000000e-01 : f32
    %179 = vector.broadcast %cst_76 : f32 to vector<8x4xf32>
    %180 = arith.subf %0, %179 : vector<8x4xf32>
    %cst_77 = arith.constant 2.500000e+00 : f32
    %181 = vector.broadcast %cst_77 : f32 to vector<8x4xf32>
    %182 = arith.mulf %180, %181 : vector<8x4xf32>
    %183 = arith.mulf %182, %77 : vector<8x4xf32>
    %cst_78 = arith.constant 1.400000e+00 : f32
    %184 = vector.broadcast %cst_78 : f32 to vector<8x4xf32>
    %185 = arith.subf %184, %0 : vector<8x4xf32>
    %cst_79 = arith.constant 2.500000e+00 : f32
    %186 = vector.broadcast %cst_79 : f32 to vector<8x4xf32>
    %187 = arith.mulf %185, %186 : vector<8x4xf32>
    %188 = arith.mulf %187, %85 : vector<8x4xf32>
    %189 = arith.addf %183, %188 : vector<8x4xf32>
    %cst_80 = arith.constant 1.000000e+00 : f32
    %190 = vector.broadcast %cst_80 : f32 to vector<8x4xf32>
    %191 = arith.subf %0, %190 : vector<8x4xf32>
    %cst_81 = arith.constant 2.500000e+00 : f32
    %192 = vector.broadcast %cst_81 : f32 to vector<8x4xf32>
    %193 = arith.mulf %191, %192 : vector<8x4xf32>
    %194 = arith.mulf %193, %85 : vector<8x4xf32>
    %cst_82 = arith.constant 1.800000e+00 : f32
    %195 = vector.broadcast %cst_82 : f32 to vector<8x4xf32>
    %196 = arith.subf %195, %0 : vector<8x4xf32>
    %cst_83 = arith.constant 2.500000e+00 : f32
    %197 = vector.broadcast %cst_83 : f32 to vector<8x4xf32>
    %198 = arith.mulf %196, %197 : vector<8x4xf32>
    %199 = arith.mulf %198, %93 : vector<8x4xf32>
    %200 = arith.addf %194, %199 : vector<8x4xf32>
    %cst_84 = arith.constant 1.400000e+00 : f32
    %201 = vector.broadcast %cst_84 : f32 to vector<8x4xf32>
    %202 = arith.subf %0, %201 : vector<8x4xf32>
    %cst_85 = arith.constant 2.500000e+00 : f32
    %203 = vector.broadcast %cst_85 : f32 to vector<8x4xf32>
    %204 = arith.mulf %202, %203 : vector<8x4xf32>
    %205 = arith.mulf %204, %93 : vector<8x4xf32>
    %cst_86 = arith.constant 2.200000e+00 : f32
    %206 = vector.broadcast %cst_86 : f32 to vector<8x4xf32>
    %207 = arith.subf %206, %0 : vector<8x4xf32>
    %cst_87 = arith.constant 2.500000e+00 : f32
    %208 = vector.broadcast %cst_87 : f32 to vector<8x4xf32>
    %209 = arith.mulf %207, %208 : vector<8x4xf32>
    %210 = arith.mulf %209, %101 : vector<8x4xf32>
    %211 = arith.addf %205, %210 : vector<8x4xf32>
    %cst_88 = arith.constant -2.200000e+00 : f32
    %212 = vector.broadcast %cst_88 : f32 to vector<8x4xf32>
    %213 = arith.subf %0, %212 : vector<8x4xf32>
    %cst_89 = arith.constant 1.250000e+00 : f32
    %214 = vector.broadcast %cst_89 : f32 to vector<8x4xf32>
    %215 = arith.mulf %213, %214 : vector<8x4xf32>
    %216 = arith.mulf %215, %112 : vector<8x4xf32>
    %cst_90 = arith.constant -1.000000e+00 : f32
    %217 = vector.broadcast %cst_90 : f32 to vector<8x4xf32>
    %218 = arith.subf %217, %0 : vector<8x4xf32>
    %cst_91 = arith.constant 1.250000e+00 : f32
    %219 = vector.broadcast %cst_91 : f32 to vector<8x4xf32>
    %220 = arith.mulf %218, %219 : vector<8x4xf32>
    %221 = arith.mulf %220, %123 : vector<8x4xf32>
    %222 = arith.addf %216, %221 : vector<8x4xf32>
    %cst_92 = arith.constant -1.800000e+00 : f32
    %223 = vector.broadcast %cst_92 : f32 to vector<8x4xf32>
    %224 = arith.subf %0, %223 : vector<8x4xf32>
    %cst_93 = arith.constant 1.250000e+00 : f32
    %225 = vector.broadcast %cst_93 : f32 to vector<8x4xf32>
    %226 = arith.mulf %224, %225 : vector<8x4xf32>
    %227 = arith.mulf %226, %123 : vector<8x4xf32>
    %cst_94 = arith.constant -6.000000e-01 : f32
    %228 = vector.broadcast %cst_94 : f32 to vector<8x4xf32>
    %229 = arith.subf %228, %0 : vector<8x4xf32>
    %cst_95 = arith.constant 1.250000e+00 : f32
    %230 = vector.broadcast %cst_95 : f32 to vector<8x4xf32>
    %231 = arith.mulf %229, %230 : vector<8x4xf32>
    %232 = arith.mulf %231, %134 : vector<8x4xf32>
    %233 = arith.addf %227, %232 : vector<8x4xf32>
    %cst_96 = arith.constant -1.400000e+00 : f32
    %234 = vector.broadcast %cst_96 : f32 to vector<8x4xf32>
    %235 = arith.subf %0, %234 : vector<8x4xf32>
    %cst_97 = arith.constant 1.250000e+00 : f32
    %236 = vector.broadcast %cst_97 : f32 to vector<8x4xf32>
    %237 = arith.mulf %235, %236 : vector<8x4xf32>
    %238 = arith.mulf %237, %134 : vector<8x4xf32>
    %cst_98 = arith.constant -2.000000e-01 : f32
    %239 = vector.broadcast %cst_98 : f32 to vector<8x4xf32>
    %240 = arith.subf %239, %0 : vector<8x4xf32>
    %cst_99 = arith.constant 1.250000e+00 : f32
    %241 = vector.broadcast %cst_99 : f32 to vector<8x4xf32>
    %242 = arith.mulf %240, %241 : vector<8x4xf32>
    %243 = arith.mulf %242, %145 : vector<8x4xf32>
    %244 = arith.addf %238, %243 : vector<8x4xf32>
    %cst_100 = arith.constant -1.000000e+00 : f32
    %245 = vector.broadcast %cst_100 : f32 to vector<8x4xf32>
    %246 = arith.subf %0, %245 : vector<8x4xf32>
    %cst_101 = arith.constant 1.250000e+00 : f32
    %247 = vector.broadcast %cst_101 : f32 to vector<8x4xf32>
    %248 = arith.mulf %246, %247 : vector<8x4xf32>
    %249 = arith.mulf %248, %145 : vector<8x4xf32>
    %cst_102 = arith.constant 2.000000e-01 : f32
    %250 = vector.broadcast %cst_102 : f32 to vector<8x4xf32>
    %251 = arith.subf %250, %0 : vector<8x4xf32>
    %cst_103 = arith.constant 1.250000e+00 : f32
    %252 = vector.broadcast %cst_103 : f32 to vector<8x4xf32>
    %253 = arith.mulf %251, %252 : vector<8x4xf32>
    %254 = arith.mulf %253, %156 : vector<8x4xf32>
    %255 = arith.addf %249, %254 : vector<8x4xf32>
    %cst_104 = arith.constant -6.000000e-01 : f32
    %256 = vector.broadcast %cst_104 : f32 to vector<8x4xf32>
    %257 = arith.subf %0, %256 : vector<8x4xf32>
    %cst_105 = arith.constant 1.250000e+00 : f32
    %258 = vector.broadcast %cst_105 : f32 to vector<8x4xf32>
    %259 = arith.mulf %257, %258 : vector<8x4xf32>
    %260 = arith.mulf %259, %156 : vector<8x4xf32>
    %cst_106 = arith.constant 6.000000e-01 : f32
    %261 = vector.broadcast %cst_106 : f32 to vector<8x4xf32>
    %262 = arith.subf %261, %0 : vector<8x4xf32>
    %cst_107 = arith.constant 1.250000e+00 : f32
    %263 = vector.broadcast %cst_107 : f32 to vector<8x4xf32>
    %264 = arith.mulf %262, %263 : vector<8x4xf32>
    %265 = arith.mulf %264, %167 : vector<8x4xf32>
    %266 = arith.addf %260, %265 : vector<8x4xf32>
    %cst_108 = arith.constant -2.000000e-01 : f32
    %267 = vector.broadcast %cst_108 : f32 to vector<8x4xf32>
    %268 = arith.subf %0, %267 : vector<8x4xf32>
    %cst_109 = arith.constant 1.250000e+00 : f32
    %269 = vector.broadcast %cst_109 : f32 to vector<8x4xf32>
    %270 = arith.mulf %268, %269 : vector<8x4xf32>
    %271 = arith.mulf %270, %167 : vector<8x4xf32>
    %cst_110 = arith.constant 1.000000e+00 : f32
    %272 = vector.broadcast %cst_110 : f32 to vector<8x4xf32>
    %273 = arith.subf %272, %0 : vector<8x4xf32>
    %cst_111 = arith.constant 1.250000e+00 : f32
    %274 = vector.broadcast %cst_111 : f32 to vector<8x4xf32>
    %275 = arith.mulf %273, %274 : vector<8x4xf32>
    %276 = arith.mulf %275, %178 : vector<8x4xf32>
    %277 = arith.addf %271, %276 : vector<8x4xf32>
    %cst_112 = arith.constant 2.000000e-01 : f32
    %278 = vector.broadcast %cst_112 : f32 to vector<8x4xf32>
    %279 = arith.subf %0, %278 : vector<8x4xf32>
    %cst_113 = arith.constant 1.250000e+00 : f32
    %280 = vector.broadcast %cst_113 : f32 to vector<8x4xf32>
    %281 = arith.mulf %279, %280 : vector<8x4xf32>
    %282 = arith.mulf %281, %178 : vector<8x4xf32>
    %cst_114 = arith.constant 1.400000e+00 : f32
    %283 = vector.broadcast %cst_114 : f32 to vector<8x4xf32>
    %284 = arith.subf %283, %0 : vector<8x4xf32>
    %cst_115 = arith.constant 1.250000e+00 : f32
    %285 = vector.broadcast %cst_115 : f32 to vector<8x4xf32>
    %286 = arith.mulf %284, %285 : vector<8x4xf32>
    %287 = arith.mulf %286, %189 : vector<8x4xf32>
    %288 = arith.addf %282, %287 : vector<8x4xf32>
    %cst_116 = arith.constant 6.000000e-01 : f32
    %289 = vector.broadcast %cst_116 : f32 to vector<8x4xf32>
    %290 = arith.subf %0, %289 : vector<8x4xf32>
    %cst_117 = arith.constant 1.250000e+00 : f32
    %291 = vector.broadcast %cst_117 : f32 to vector<8x4xf32>
    %292 = arith.mulf %290, %291 : vector<8x4xf32>
    %293 = arith.mulf %292, %189 : vector<8x4xf32>
    %cst_118 = arith.constant 1.800000e+00 : f32
    %294 = vector.broadcast %cst_118 : f32 to vector<8x4xf32>
    %295 = arith.subf %294, %0 : vector<8x4xf32>
    %cst_119 = arith.constant 1.250000e+00 : f32
    %296 = vector.broadcast %cst_119 : f32 to vector<8x4xf32>
    %297 = arith.mulf %295, %296 : vector<8x4xf32>
    %298 = arith.mulf %297, %200 : vector<8x4xf32>
    %299 = arith.addf %293, %298 : vector<8x4xf32>
    %cst_120 = arith.constant 1.000000e+00 : f32
    %300 = vector.broadcast %cst_120 : f32 to vector<8x4xf32>
    %301 = arith.subf %0, %300 : vector<8x4xf32>
    %cst_121 = arith.constant 1.250000e+00 : f32
    %302 = vector.broadcast %cst_121 : f32 to vector<8x4xf32>
    %303 = arith.mulf %301, %302 : vector<8x4xf32>
    %304 = arith.mulf %303, %200 : vector<8x4xf32>
    %cst_122 = arith.constant 2.200000e+00 : f32
    %305 = vector.broadcast %cst_122 : f32 to vector<8x4xf32>
    %306 = arith.subf %305, %0 : vector<8x4xf32>
    %cst_123 = arith.constant 1.250000e+00 : f32
    %307 = vector.broadcast %cst_123 : f32 to vector<8x4xf32>
    %308 = arith.mulf %306, %307 : vector<8x4xf32>
    %309 = arith.mulf %308, %211 : vector<8x4xf32>
    %310 = arith.addf %304, %309 : vector<8x4xf32>
    %cst_124 = arith.constant -2.200000e+00 : f32
    %311 = vector.broadcast %cst_124 : f32 to vector<8x4xf32>
    %312 = arith.subf %0, %311 : vector<8x4xf32>
    %cst_125 = arith.constant 0.833333313 : f32
    %313 = vector.broadcast %cst_125 : f32 to vector<8x4xf32>
    %314 = arith.mulf %312, %313 : vector<8x4xf32>
    %315 = arith.mulf %314, %222 : vector<8x4xf32>
    %cst_126 = arith.constant -6.000000e-01 : f32
    %316 = vector.broadcast %cst_126 : f32 to vector<8x4xf32>
    %317 = arith.subf %316, %0 : vector<8x4xf32>
    %cst_127 = arith.constant 0.833333313 : f32
    %318 = vector.broadcast %cst_127 : f32 to vector<8x4xf32>
    %319 = arith.mulf %317, %318 : vector<8x4xf32>
    %320 = arith.mulf %319, %233 : vector<8x4xf32>
    %321 = arith.addf %315, %320 : vector<8x4xf32>
    %cst_128 = arith.constant -1.800000e+00 : f32
    %322 = vector.broadcast %cst_128 : f32 to vector<8x4xf32>
    %323 = arith.subf %0, %322 : vector<8x4xf32>
    %cst_129 = arith.constant 0.833333313 : f32
    %324 = vector.broadcast %cst_129 : f32 to vector<8x4xf32>
    %325 = arith.mulf %323, %324 : vector<8x4xf32>
    %326 = arith.mulf %325, %233 : vector<8x4xf32>
    %cst_130 = arith.constant -2.000000e-01 : f32
    %327 = vector.broadcast %cst_130 : f32 to vector<8x4xf32>
    %328 = arith.subf %327, %0 : vector<8x4xf32>
    %cst_131 = arith.constant 0.833333313 : f32
    %329 = vector.broadcast %cst_131 : f32 to vector<8x4xf32>
    %330 = arith.mulf %328, %329 : vector<8x4xf32>
    %331 = arith.mulf %330, %244 : vector<8x4xf32>
    %332 = arith.addf %326, %331 : vector<8x4xf32>
    %cst_132 = arith.constant -1.400000e+00 : f32
    %333 = vector.broadcast %cst_132 : f32 to vector<8x4xf32>
    %334 = arith.subf %0, %333 : vector<8x4xf32>
    %cst_133 = arith.constant 0.833333313 : f32
    %335 = vector.broadcast %cst_133 : f32 to vector<8x4xf32>
    %336 = arith.mulf %334, %335 : vector<8x4xf32>
    %337 = arith.mulf %336, %244 : vector<8x4xf32>
    %cst_134 = arith.constant 2.000000e-01 : f32
    %338 = vector.broadcast %cst_134 : f32 to vector<8x4xf32>
    %339 = arith.subf %338, %0 : vector<8x4xf32>
    %cst_135 = arith.constant 0.833333313 : f32
    %340 = vector.broadcast %cst_135 : f32 to vector<8x4xf32>
    %341 = arith.mulf %339, %340 : vector<8x4xf32>
    %342 = arith.mulf %341, %255 : vector<8x4xf32>
    %343 = arith.addf %337, %342 : vector<8x4xf32>
    %cst_136 = arith.constant -1.000000e+00 : f32
    %344 = vector.broadcast %cst_136 : f32 to vector<8x4xf32>
    %345 = arith.subf %0, %344 : vector<8x4xf32>
    %cst_137 = arith.constant 0.833333313 : f32
    %346 = vector.broadcast %cst_137 : f32 to vector<8x4xf32>
    %347 = arith.mulf %345, %346 : vector<8x4xf32>
    %348 = arith.mulf %347, %255 : vector<8x4xf32>
    %cst_138 = arith.constant 6.000000e-01 : f32
    %349 = vector.broadcast %cst_138 : f32 to vector<8x4xf32>
    %350 = arith.subf %349, %0 : vector<8x4xf32>
    %cst_139 = arith.constant 0.833333313 : f32
    %351 = vector.broadcast %cst_139 : f32 to vector<8x4xf32>
    %352 = arith.mulf %350, %351 : vector<8x4xf32>
    %353 = arith.mulf %352, %266 : vector<8x4xf32>
    %354 = arith.addf %348, %353 : vector<8x4xf32>
    %cst_140 = arith.constant -6.000000e-01 : f32
    %355 = vector.broadcast %cst_140 : f32 to vector<8x4xf32>
    %356 = arith.subf %0, %355 : vector<8x4xf32>
    %cst_141 = arith.constant 0.833333313 : f32
    %357 = vector.broadcast %cst_141 : f32 to vector<8x4xf32>
    %358 = arith.mulf %356, %357 : vector<8x4xf32>
    %359 = arith.mulf %358, %266 : vector<8x4xf32>
    %cst_142 = arith.constant 1.000000e+00 : f32
    %360 = vector.broadcast %cst_142 : f32 to vector<8x4xf32>
    %361 = arith.subf %360, %0 : vector<8x4xf32>
    %cst_143 = arith.constant 0.833333313 : f32
    %362 = vector.broadcast %cst_143 : f32 to vector<8x4xf32>
    %363 = arith.mulf %361, %362 : vector<8x4xf32>
    %364 = arith.mulf %363, %277 : vector<8x4xf32>
    %365 = arith.addf %359, %364 : vector<8x4xf32>
    %cst_144 = arith.constant -2.000000e-01 : f32
    %366 = vector.broadcast %cst_144 : f32 to vector<8x4xf32>
    %367 = arith.subf %0, %366 : vector<8x4xf32>
    %cst_145 = arith.constant 0.833333313 : f32
    %368 = vector.broadcast %cst_145 : f32 to vector<8x4xf32>
    %369 = arith.mulf %367, %368 : vector<8x4xf32>
    %370 = arith.mulf %369, %277 : vector<8x4xf32>
    %cst_146 = arith.constant 1.400000e+00 : f32
    %371 = vector.broadcast %cst_146 : f32 to vector<8x4xf32>
    %372 = arith.subf %371, %0 : vector<8x4xf32>
    %cst_147 = arith.constant 0.833333313 : f32
    %373 = vector.broadcast %cst_147 : f32 to vector<8x4xf32>
    %374 = arith.mulf %372, %373 : vector<8x4xf32>
    %375 = arith.mulf %374, %288 : vector<8x4xf32>
    %376 = arith.addf %370, %375 : vector<8x4xf32>
    %cst_148 = arith.constant 2.000000e-01 : f32
    %377 = vector.broadcast %cst_148 : f32 to vector<8x4xf32>
    %378 = arith.subf %0, %377 : vector<8x4xf32>
    %cst_149 = arith.constant 0.833333313 : f32
    %379 = vector.broadcast %cst_149 : f32 to vector<8x4xf32>
    %380 = arith.mulf %378, %379 : vector<8x4xf32>
    %381 = arith.mulf %380, %288 : vector<8x4xf32>
    %cst_150 = arith.constant 1.800000e+00 : f32
    %382 = vector.broadcast %cst_150 : f32 to vector<8x4xf32>
    %383 = arith.subf %382, %0 : vector<8x4xf32>
    %cst_151 = arith.constant 0.833333313 : f32
    %384 = vector.broadcast %cst_151 : f32 to vector<8x4xf32>
    %385 = arith.mulf %383, %384 : vector<8x4xf32>
    %386 = arith.mulf %385, %299 : vector<8x4xf32>
    %387 = arith.addf %381, %386 : vector<8x4xf32>
    %cst_152 = arith.constant 6.000000e-01 : f32
    %388 = vector.broadcast %cst_152 : f32 to vector<8x4xf32>
    %389 = arith.subf %0, %388 : vector<8x4xf32>
    %cst_153 = arith.constant 0.833333313 : f32
    %390 = vector.broadcast %cst_153 : f32 to vector<8x4xf32>
    %391 = arith.mulf %389, %390 : vector<8x4xf32>
    %392 = arith.mulf %391, %299 : vector<8x4xf32>
    %cst_154 = arith.constant 2.200000e+00 : f32
    %393 = vector.broadcast %cst_154 : f32 to vector<8x4xf32>
    %394 = arith.subf %393, %0 : vector<8x4xf32>
    %cst_155 = arith.constant 0.833333313 : f32
    %395 = vector.broadcast %cst_155 : f32 to vector<8x4xf32>
    %396 = arith.mulf %394, %395 : vector<8x4xf32>
    %397 = arith.mulf %396, %310 : vector<8x4xf32>
    %398 = arith.addf %392, %397 : vector<8x4xf32>
    %399 = tpu.concatenate %13, %321, %332, %343, %354, %365, %376, %387, %398 in 1 : vector<8x4xf32>, vector<8x4xf32>, vector<8x4xf32>, vector<8x4xf32>, vector<8x4xf32>, vector<8x4xf32>, vector<8x4xf32>, vector<8x4xf32>, vector<8x4xf32> -> vector<8x36xf32>
    %c0_156 = arith.constant 0 : index
    %c0_157 = arith.constant 0 : index
    %400 = vector.load %arg3[%c0_156, %c0_157] : memref<36x8xf32, #tpu.memory_space<vmem>>, vector<36x8xf32>
    %cst_158 = arith.constant dense<0.000000e+00> : vector<8x8xf32>
    %401 = tpu.matmul %399, %400, %cst_158 {dimension_numbers = #tpu.dot_dimension_numbers<[1], [0], [0], [1], [0, 0, 1, 1], [], []>} : vector<8x36xf32>, vector<36x8xf32>, vector<8x8xf32> -> vector<8x8xf32>
    %402 = math.absf %401 : vector<8x8xf32>
    %cst_159 = arith.constant 0.000000e+00 : f32
    %403 = vector.broadcast %cst_159 : f32 to vector<8x8xf32>
    %404 = arith.subf %403, %402 : vector<8x8xf32>
    %405 = math.exp %404 : vector<8x8xf32>
    %cst_160 = arith.constant 1.000000e+00 : f32
    %406 = vector.broadcast %cst_160 : f32 to vector<8x8xf32>
    %407 = arith.addf %406, %405 : vector<8x8xf32>
    %cst_161 = arith.constant 1.000000e+00 : f32
    %408 = vector.broadcast %cst_161 : f32 to vector<8x8xf32>
    %409 = arith.divf %408, %407 : vector<8x8xf32>
    %cst_162 = arith.constant 0.000000e+00 : f32
    %410 = vector.broadcast %cst_162 : f32 to vector<8x8xf32>
    %411 = arith.cmpf oge, %401, %410 : vector<8x8xf32>
    %412 = arith.mulf %405, %409 : vector<8x8xf32>
    %413 = arith.select %411, %409, %412 : vector<8x8xi1>, vector<8x8xf32>
    %414 = arith.mulf %401, %413 : vector<8x8xf32>
    %cst_163 = arith.constant -2.200000e+00 : f32
    %415 = vector.broadcast %cst_163 : f32 to vector<8x8xf32>
    %416 = arith.cmpf oge, %401, %415 : vector<8x8xf32>
    %cst_164 = arith.constant -1.800000e+00 : f32
    %417 = vector.broadcast %cst_164 : f32 to vector<8x8xf32>
    %418 = arith.cmpf olt, %401, %417 : vector<8x8xf32>
    %419 = arith.andi %416, %418 : vector<8x8xi1>
    %cst_165 = arith.constant 1.000000e+00 : f32
    %cst_166 = arith.constant 0.000000e+00 : f32
    %420 = vector.broadcast %cst_165 : f32 to vector<8x8xf32>
    %421 = vector.broadcast %cst_166 : f32 to vector<8x8xf32>
    %422 = arith.select %419, %420, %421 : vector<8x8xi1>, vector<8x8xf32>
    %cst_167 = arith.constant -1.800000e+00 : f32
    %423 = vector.broadcast %cst_167 : f32 to vector<8x8xf32>
    %424 = arith.cmpf oge, %401, %423 : vector<8x8xf32>
    %cst_168 = arith.constant -1.400000e+00 : f32
    %425 = vector.broadcast %cst_168 : f32 to vector<8x8xf32>
    %426 = arith.cmpf olt, %401, %425 : vector<8x8xf32>
    %427 = arith.andi %424, %426 : vector<8x8xi1>
    %cst_169 = arith.constant 1.000000e+00 : f32
    %cst_170 = arith.constant 0.000000e+00 : f32
    %428 = vector.broadcast %cst_169 : f32 to vector<8x8xf32>
    %429 = vector.broadcast %cst_170 : f32 to vector<8x8xf32>
    %430 = arith.select %427, %428, %429 : vector<8x8xi1>, vector<8x8xf32>
    %cst_171 = arith.constant -1.400000e+00 : f32
    %431 = vector.broadcast %cst_171 : f32 to vector<8x8xf32>
    %432 = arith.cmpf oge, %401, %431 : vector<8x8xf32>
    %cst_172 = arith.constant -1.000000e+00 : f32
    %433 = vector.broadcast %cst_172 : f32 to vector<8x8xf32>
    %434 = arith.cmpf olt, %401, %433 : vector<8x8xf32>
    %435 = arith.andi %432, %434 : vector<8x8xi1>
    %cst_173 = arith.constant 1.000000e+00 : f32
    %cst_174 = arith.constant 0.000000e+00 : f32
    %436 = vector.broadcast %cst_173 : f32 to vector<8x8xf32>
    %437 = vector.broadcast %cst_174 : f32 to vector<8x8xf32>
    %438 = arith.select %435, %436, %437 : vector<8x8xi1>, vector<8x8xf32>
    %cst_175 = arith.constant -1.000000e+00 : f32
    %439 = vector.broadcast %cst_175 : f32 to vector<8x8xf32>
    %440 = arith.cmpf oge, %401, %439 : vector<8x8xf32>
    %cst_176 = arith.constant -6.000000e-01 : f32
    %441 = vector.broadcast %cst_176 : f32 to vector<8x8xf32>
    %442 = arith.cmpf olt, %401, %441 : vector<8x8xf32>
    %443 = arith.andi %440, %442 : vector<8x8xi1>
    %cst_177 = arith.constant 1.000000e+00 : f32
    %cst_178 = arith.constant 0.000000e+00 : f32
    %444 = vector.broadcast %cst_177 : f32 to vector<8x8xf32>
    %445 = vector.broadcast %cst_178 : f32 to vector<8x8xf32>
    %446 = arith.select %443, %444, %445 : vector<8x8xi1>, vector<8x8xf32>
    %cst_179 = arith.constant -6.000000e-01 : f32
    %447 = vector.broadcast %cst_179 : f32 to vector<8x8xf32>
    %448 = arith.cmpf oge, %401, %447 : vector<8x8xf32>
    %cst_180 = arith.constant -2.000000e-01 : f32
    %449 = vector.broadcast %cst_180 : f32 to vector<8x8xf32>
    %450 = arith.cmpf olt, %401, %449 : vector<8x8xf32>
    %451 = arith.andi %448, %450 : vector<8x8xi1>
    %cst_181 = arith.constant 1.000000e+00 : f32
    %cst_182 = arith.constant 0.000000e+00 : f32
    %452 = vector.broadcast %cst_181 : f32 to vector<8x8xf32>
    %453 = vector.broadcast %cst_182 : f32 to vector<8x8xf32>
    %454 = arith.select %451, %452, %453 : vector<8x8xi1>, vector<8x8xf32>
    %cst_183 = arith.constant -2.000000e-01 : f32
    %455 = vector.broadcast %cst_183 : f32 to vector<8x8xf32>
    %456 = arith.cmpf oge, %401, %455 : vector<8x8xf32>
    %cst_184 = arith.constant 2.000000e-01 : f32
    %457 = vector.broadcast %cst_184 : f32 to vector<8x8xf32>
    %458 = arith.cmpf olt, %401, %457 : vector<8x8xf32>
    %459 = arith.andi %456, %458 : vector<8x8xi1>
    %cst_185 = arith.constant 1.000000e+00 : f32
    %cst_186 = arith.constant 0.000000e+00 : f32
    %460 = vector.broadcast %cst_185 : f32 to vector<8x8xf32>
    %461 = vector.broadcast %cst_186 : f32 to vector<8x8xf32>
    %462 = arith.select %459, %460, %461 : vector<8x8xi1>, vector<8x8xf32>
    %cst_187 = arith.constant 2.000000e-01 : f32
    %463 = vector.broadcast %cst_187 : f32 to vector<8x8xf32>
    %464 = arith.cmpf oge, %401, %463 : vector<8x8xf32>
    %cst_188 = arith.constant 6.000000e-01 : f32
    %465 = vector.broadcast %cst_188 : f32 to vector<8x8xf32>
    %466 = arith.cmpf olt, %401, %465 : vector<8x8xf32>
    %467 = arith.andi %464, %466 : vector<8x8xi1>
    %cst_189 = arith.constant 1.000000e+00 : f32
    %cst_190 = arith.constant 0.000000e+00 : f32
    %468 = vector.broadcast %cst_189 : f32 to vector<8x8xf32>
    %469 = vector.broadcast %cst_190 : f32 to vector<8x8xf32>
    %470 = arith.select %467, %468, %469 : vector<8x8xi1>, vector<8x8xf32>
    %cst_191 = arith.constant 6.000000e-01 : f32
    %471 = vector.broadcast %cst_191 : f32 to vector<8x8xf32>
    %472 = arith.cmpf oge, %401, %471 : vector<8x8xf32>
    %cst_192 = arith.constant 1.000000e+00 : f32
    %473 = vector.broadcast %cst_192 : f32 to vector<8x8xf32>
    %474 = arith.cmpf olt, %401, %473 : vector<8x8xf32>
    %475 = arith.andi %472, %474 : vector<8x8xi1>
    %cst_193 = arith.constant 1.000000e+00 : f32
    %cst_194 = arith.constant 0.000000e+00 : f32
    %476 = vector.broadcast %cst_193 : f32 to vector<8x8xf32>
    %477 = vector.broadcast %cst_194 : f32 to vector<8x8xf32>
    %478 = arith.select %475, %476, %477 : vector<8x8xi1>, vector<8x8xf32>
    %cst_195 = arith.constant 1.000000e+00 : f32
    %479 = vector.broadcast %cst_195 : f32 to vector<8x8xf32>
    %480 = arith.cmpf oge, %401, %479 : vector<8x8xf32>
    %cst_196 = arith.constant 1.400000e+00 : f32
    %481 = vector.broadcast %cst_196 : f32 to vector<8x8xf32>
    %482 = arith.cmpf olt, %401, %481 : vector<8x8xf32>
    %483 = arith.andi %480, %482 : vector<8x8xi1>
    %cst_197 = arith.constant 1.000000e+00 : f32
    %cst_198 = arith.constant 0.000000e+00 : f32
    %484 = vector.broadcast %cst_197 : f32 to vector<8x8xf32>
    %485 = vector.broadcast %cst_198 : f32 to vector<8x8xf32>
    %486 = arith.select %483, %484, %485 : vector<8x8xi1>, vector<8x8xf32>
    %cst_199 = arith.constant 1.400000e+00 : f32
    %487 = vector.broadcast %cst_199 : f32 to vector<8x8xf32>
    %488 = arith.cmpf oge, %401, %487 : vector<8x8xf32>
    %cst_200 = arith.constant 1.800000e+00 : f32
    %489 = vector.broadcast %cst_200 : f32 to vector<8x8xf32>
    %490 = arith.cmpf olt, %401, %489 : vector<8x8xf32>
    %491 = arith.andi %488, %490 : vector<8x8xi1>
    %cst_201 = arith.constant 1.000000e+00 : f32
    %cst_202 = arith.constant 0.000000e+00 : f32
    %492 = vector.broadcast %cst_201 : f32 to vector<8x8xf32>
    %493 = vector.broadcast %cst_202 : f32 to vector<8x8xf32>
    %494 = arith.select %491, %492, %493 : vector<8x8xi1>, vector<8x8xf32>
    %cst_203 = arith.constant 1.800000e+00 : f32
    %495 = vector.broadcast %cst_203 : f32 to vector<8x8xf32>
    %496 = arith.cmpf oge, %401, %495 : vector<8x8xf32>
    %cst_204 = arith.constant 2.200000e+00 : f32
    %497 = vector.broadcast %cst_204 : f32 to vector<8x8xf32>
    %498 = arith.cmpf olt, %401, %497 : vector<8x8xf32>
    %499 = arith.andi %496, %498 : vector<8x8xi1>
    %cst_205 = arith.constant 1.000000e+00 : f32
    %cst_206 = arith.constant 0.000000e+00 : f32
    %500 = vector.broadcast %cst_205 : f32 to vector<8x8xf32>
    %501 = vector.broadcast %cst_206 : f32 to vector<8x8xf32>
    %502 = arith.select %499, %500, %501 : vector<8x8xi1>, vector<8x8xf32>
    %cst_207 = arith.constant -2.200000e+00 : f32
    %503 = vector.broadcast %cst_207 : f32 to vector<8x8xf32>
    %504 = arith.subf %401, %503 : vector<8x8xf32>
    %cst_208 = arith.constant 2.500000e+00 : f32
    %505 = vector.broadcast %cst_208 : f32 to vector<8x8xf32>
    %506 = arith.mulf %504, %505 : vector<8x8xf32>
    %507 = arith.mulf %506, %422 : vector<8x8xf32>
    %cst_209 = arith.constant -1.400000e+00 : f32
    %508 = vector.broadcast %cst_209 : f32 to vector<8x8xf32>
    %509 = arith.subf %508, %401 : vector<8x8xf32>
    %cst_210 = arith.constant 2.500000e+00 : f32
    %510 = vector.broadcast %cst_210 : f32 to vector<8x8xf32>
    %511 = arith.mulf %509, %510 : vector<8x8xf32>
    %512 = arith.mulf %511, %430 : vector<8x8xf32>
    %513 = arith.addf %507, %512 : vector<8x8xf32>
    %cst_211 = arith.constant -1.800000e+00 : f32
    %514 = vector.broadcast %cst_211 : f32 to vector<8x8xf32>
    %515 = arith.subf %401, %514 : vector<8x8xf32>
    %cst_212 = arith.constant 2.500000e+00 : f32
    %516 = vector.broadcast %cst_212 : f32 to vector<8x8xf32>
    %517 = arith.mulf %515, %516 : vector<8x8xf32>
    %518 = arith.mulf %517, %430 : vector<8x8xf32>
    %cst_213 = arith.constant -1.000000e+00 : f32
    %519 = vector.broadcast %cst_213 : f32 to vector<8x8xf32>
    %520 = arith.subf %519, %401 : vector<8x8xf32>
    %cst_214 = arith.constant 2.500000e+00 : f32
    %521 = vector.broadcast %cst_214 : f32 to vector<8x8xf32>
    %522 = arith.mulf %520, %521 : vector<8x8xf32>
    %523 = arith.mulf %522, %438 : vector<8x8xf32>
    %524 = arith.addf %518, %523 : vector<8x8xf32>
    %cst_215 = arith.constant -1.400000e+00 : f32
    %525 = vector.broadcast %cst_215 : f32 to vector<8x8xf32>
    %526 = arith.subf %401, %525 : vector<8x8xf32>
    %cst_216 = arith.constant 2.500000e+00 : f32
    %527 = vector.broadcast %cst_216 : f32 to vector<8x8xf32>
    %528 = arith.mulf %526, %527 : vector<8x8xf32>
    %529 = arith.mulf %528, %438 : vector<8x8xf32>
    %cst_217 = arith.constant -6.000000e-01 : f32
    %530 = vector.broadcast %cst_217 : f32 to vector<8x8xf32>
    %531 = arith.subf %530, %401 : vector<8x8xf32>
    %cst_218 = arith.constant 2.500000e+00 : f32
    %532 = vector.broadcast %cst_218 : f32 to vector<8x8xf32>
    %533 = arith.mulf %531, %532 : vector<8x8xf32>
    %534 = arith.mulf %533, %446 : vector<8x8xf32>
    %535 = arith.addf %529, %534 : vector<8x8xf32>
    %cst_219 = arith.constant -1.000000e+00 : f32
    %536 = vector.broadcast %cst_219 : f32 to vector<8x8xf32>
    %537 = arith.subf %401, %536 : vector<8x8xf32>
    %cst_220 = arith.constant 2.500000e+00 : f32
    %538 = vector.broadcast %cst_220 : f32 to vector<8x8xf32>
    %539 = arith.mulf %537, %538 : vector<8x8xf32>
    %540 = arith.mulf %539, %446 : vector<8x8xf32>
    %cst_221 = arith.constant -2.000000e-01 : f32
    %541 = vector.broadcast %cst_221 : f32 to vector<8x8xf32>
    %542 = arith.subf %541, %401 : vector<8x8xf32>
    %cst_222 = arith.constant 2.500000e+00 : f32
    %543 = vector.broadcast %cst_222 : f32 to vector<8x8xf32>
    %544 = arith.mulf %542, %543 : vector<8x8xf32>
    %545 = arith.mulf %544, %454 : vector<8x8xf32>
    %546 = arith.addf %540, %545 : vector<8x8xf32>
    %cst_223 = arith.constant -6.000000e-01 : f32
    %547 = vector.broadcast %cst_223 : f32 to vector<8x8xf32>
    %548 = arith.subf %401, %547 : vector<8x8xf32>
    %cst_224 = arith.constant 2.500000e+00 : f32
    %549 = vector.broadcast %cst_224 : f32 to vector<8x8xf32>
    %550 = arith.mulf %548, %549 : vector<8x8xf32>
    %551 = arith.mulf %550, %454 : vector<8x8xf32>
    %cst_225 = arith.constant 2.000000e-01 : f32
    %552 = vector.broadcast %cst_225 : f32 to vector<8x8xf32>
    %553 = arith.subf %552, %401 : vector<8x8xf32>
    %cst_226 = arith.constant 2.500000e+00 : f32
    %554 = vector.broadcast %cst_226 : f32 to vector<8x8xf32>
    %555 = arith.mulf %553, %554 : vector<8x8xf32>
    %556 = arith.mulf %555, %462 : vector<8x8xf32>
    %557 = arith.addf %551, %556 : vector<8x8xf32>
    %cst_227 = arith.constant -2.000000e-01 : f32
    %558 = vector.broadcast %cst_227 : f32 to vector<8x8xf32>
    %559 = arith.subf %401, %558 : vector<8x8xf32>
    %cst_228 = arith.constant 2.500000e+00 : f32
    %560 = vector.broadcast %cst_228 : f32 to vector<8x8xf32>
    %561 = arith.mulf %559, %560 : vector<8x8xf32>
    %562 = arith.mulf %561, %462 : vector<8x8xf32>
    %cst_229 = arith.constant 6.000000e-01 : f32
    %563 = vector.broadcast %cst_229 : f32 to vector<8x8xf32>
    %564 = arith.subf %563, %401 : vector<8x8xf32>
    %cst_230 = arith.constant 2.500000e+00 : f32
    %565 = vector.broadcast %cst_230 : f32 to vector<8x8xf32>
    %566 = arith.mulf %564, %565 : vector<8x8xf32>
    %567 = arith.mulf %566, %470 : vector<8x8xf32>
    %568 = arith.addf %562, %567 : vector<8x8xf32>
    %cst_231 = arith.constant 2.000000e-01 : f32
    %569 = vector.broadcast %cst_231 : f32 to vector<8x8xf32>
    %570 = arith.subf %401, %569 : vector<8x8xf32>
    %cst_232 = arith.constant 2.500000e+00 : f32
    %571 = vector.broadcast %cst_232 : f32 to vector<8x8xf32>
    %572 = arith.mulf %570, %571 : vector<8x8xf32>
    %573 = arith.mulf %572, %470 : vector<8x8xf32>
    %cst_233 = arith.constant 1.000000e+00 : f32
    %574 = vector.broadcast %cst_233 : f32 to vector<8x8xf32>
    %575 = arith.subf %574, %401 : vector<8x8xf32>
    %cst_234 = arith.constant 2.500000e+00 : f32
    %576 = vector.broadcast %cst_234 : f32 to vector<8x8xf32>
    %577 = arith.mulf %575, %576 : vector<8x8xf32>
    %578 = arith.mulf %577, %478 : vector<8x8xf32>
    %579 = arith.addf %573, %578 : vector<8x8xf32>
    %cst_235 = arith.constant 6.000000e-01 : f32
    %580 = vector.broadcast %cst_235 : f32 to vector<8x8xf32>
    %581 = arith.subf %401, %580 : vector<8x8xf32>
    %cst_236 = arith.constant 2.500000e+00 : f32
    %582 = vector.broadcast %cst_236 : f32 to vector<8x8xf32>
    %583 = arith.mulf %581, %582 : vector<8x8xf32>
    %584 = arith.mulf %583, %478 : vector<8x8xf32>
    %cst_237 = arith.constant 1.400000e+00 : f32
    %585 = vector.broadcast %cst_237 : f32 to vector<8x8xf32>
    %586 = arith.subf %585, %401 : vector<8x8xf32>
    %cst_238 = arith.constant 2.500000e+00 : f32
    %587 = vector.broadcast %cst_238 : f32 to vector<8x8xf32>
    %588 = arith.mulf %586, %587 : vector<8x8xf32>
    %589 = arith.mulf %588, %486 : vector<8x8xf32>
    %590 = arith.addf %584, %589 : vector<8x8xf32>
    %cst_239 = arith.constant 1.000000e+00 : f32
    %591 = vector.broadcast %cst_239 : f32 to vector<8x8xf32>
    %592 = arith.subf %401, %591 : vector<8x8xf32>
    %cst_240 = arith.constant 2.500000e+00 : f32
    %593 = vector.broadcast %cst_240 : f32 to vector<8x8xf32>
    %594 = arith.mulf %592, %593 : vector<8x8xf32>
    %595 = arith.mulf %594, %486 : vector<8x8xf32>
    %cst_241 = arith.constant 1.800000e+00 : f32
    %596 = vector.broadcast %cst_241 : f32 to vector<8x8xf32>
    %597 = arith.subf %596, %401 : vector<8x8xf32>
    %cst_242 = arith.constant 2.500000e+00 : f32
    %598 = vector.broadcast %cst_242 : f32 to vector<8x8xf32>
    %599 = arith.mulf %597, %598 : vector<8x8xf32>
    %600 = arith.mulf %599, %494 : vector<8x8xf32>
    %601 = arith.addf %595, %600 : vector<8x8xf32>
    %cst_243 = arith.constant 1.400000e+00 : f32
    %602 = vector.broadcast %cst_243 : f32 to vector<8x8xf32>
    %603 = arith.subf %401, %602 : vector<8x8xf32>
    %cst_244 = arith.constant 2.500000e+00 : f32
    %604 = vector.broadcast %cst_244 : f32 to vector<8x8xf32>
    %605 = arith.mulf %603, %604 : vector<8x8xf32>
    %606 = arith.mulf %605, %494 : vector<8x8xf32>
    %cst_245 = arith.constant 2.200000e+00 : f32
    %607 = vector.broadcast %cst_245 : f32 to vector<8x8xf32>
    %608 = arith.subf %607, %401 : vector<8x8xf32>
    %cst_246 = arith.constant 2.500000e+00 : f32
    %609 = vector.broadcast %cst_246 : f32 to vector<8x8xf32>
    %610 = arith.mulf %608, %609 : vector<8x8xf32>
    %611 = arith.mulf %610, %502 : vector<8x8xf32>
    %612 = arith.addf %606, %611 : vector<8x8xf32>
    %cst_247 = arith.constant -2.200000e+00 : f32
    %613 = vector.broadcast %cst_247 : f32 to vector<8x8xf32>
    %614 = arith.subf %401, %613 : vector<8x8xf32>
    %cst_248 = arith.constant 1.250000e+00 : f32
    %615 = vector.broadcast %cst_248 : f32 to vector<8x8xf32>
    %616 = arith.mulf %614, %615 : vector<8x8xf32>
    %617 = arith.mulf %616, %513 : vector<8x8xf32>
    %cst_249 = arith.constant -1.000000e+00 : f32
    %618 = vector.broadcast %cst_249 : f32 to vector<8x8xf32>
    %619 = arith.subf %618, %401 : vector<8x8xf32>
    %cst_250 = arith.constant 1.250000e+00 : f32
    %620 = vector.broadcast %cst_250 : f32 to vector<8x8xf32>
    %621 = arith.mulf %619, %620 : vector<8x8xf32>
    %622 = arith.mulf %621, %524 : vector<8x8xf32>
    %623 = arith.addf %617, %622 : vector<8x8xf32>
    %cst_251 = arith.constant -1.800000e+00 : f32
    %624 = vector.broadcast %cst_251 : f32 to vector<8x8xf32>
    %625 = arith.subf %401, %624 : vector<8x8xf32>
    %cst_252 = arith.constant 1.250000e+00 : f32
    %626 = vector.broadcast %cst_252 : f32 to vector<8x8xf32>
    %627 = arith.mulf %625, %626 : vector<8x8xf32>
    %628 = arith.mulf %627, %524 : vector<8x8xf32>
    %cst_253 = arith.constant -6.000000e-01 : f32
    %629 = vector.broadcast %cst_253 : f32 to vector<8x8xf32>
    %630 = arith.subf %629, %401 : vector<8x8xf32>
    %cst_254 = arith.constant 1.250000e+00 : f32
    %631 = vector.broadcast %cst_254 : f32 to vector<8x8xf32>
    %632 = arith.mulf %630, %631 : vector<8x8xf32>
    %633 = arith.mulf %632, %535 : vector<8x8xf32>
    %634 = arith.addf %628, %633 : vector<8x8xf32>
    %cst_255 = arith.constant -1.400000e+00 : f32
    %635 = vector.broadcast %cst_255 : f32 to vector<8x8xf32>
    %636 = arith.subf %401, %635 : vector<8x8xf32>
    %cst_256 = arith.constant 1.250000e+00 : f32
    %637 = vector.broadcast %cst_256 : f32 to vector<8x8xf32>
    %638 = arith.mulf %636, %637 : vector<8x8xf32>
    %639 = arith.mulf %638, %535 : vector<8x8xf32>
    %cst_257 = arith.constant -2.000000e-01 : f32
    %640 = vector.broadcast %cst_257 : f32 to vector<8x8xf32>
    %641 = arith.subf %640, %401 : vector<8x8xf32>
    %cst_258 = arith.constant 1.250000e+00 : f32
    %642 = vector.broadcast %cst_258 : f32 to vector<8x8xf32>
    %643 = arith.mulf %641, %642 : vector<8x8xf32>
    %644 = arith.mulf %643, %546 : vector<8x8xf32>
    %645 = arith.addf %639, %644 : vector<8x8xf32>
    %cst_259 = arith.constant -1.000000e+00 : f32
    %646 = vector.broadcast %cst_259 : f32 to vector<8x8xf32>
    %647 = arith.subf %401, %646 : vector<8x8xf32>
    %cst_260 = arith.constant 1.250000e+00 : f32
    %648 = vector.broadcast %cst_260 : f32 to vector<8x8xf32>
    %649 = arith.mulf %647, %648 : vector<8x8xf32>
    %650 = arith.mulf %649, %546 : vector<8x8xf32>
    %cst_261 = arith.constant 2.000000e-01 : f32
    %651 = vector.broadcast %cst_261 : f32 to vector<8x8xf32>
    %652 = arith.subf %651, %401 : vector<8x8xf32>
    %cst_262 = arith.constant 1.250000e+00 : f32
    %653 = vector.broadcast %cst_262 : f32 to vector<8x8xf32>
    %654 = arith.mulf %652, %653 : vector<8x8xf32>
    %655 = arith.mulf %654, %557 : vector<8x8xf32>
    %656 = arith.addf %650, %655 : vector<8x8xf32>
    %cst_263 = arith.constant -6.000000e-01 : f32
    %657 = vector.broadcast %cst_263 : f32 to vector<8x8xf32>
    %658 = arith.subf %401, %657 : vector<8x8xf32>
    %cst_264 = arith.constant 1.250000e+00 : f32
    %659 = vector.broadcast %cst_264 : f32 to vector<8x8xf32>
    %660 = arith.mulf %658, %659 : vector<8x8xf32>
    %661 = arith.mulf %660, %557 : vector<8x8xf32>
    %cst_265 = arith.constant 6.000000e-01 : f32
    %662 = vector.broadcast %cst_265 : f32 to vector<8x8xf32>
    %663 = arith.subf %662, %401 : vector<8x8xf32>
    %cst_266 = arith.constant 1.250000e+00 : f32
    %664 = vector.broadcast %cst_266 : f32 to vector<8x8xf32>
    %665 = arith.mulf %663, %664 : vector<8x8xf32>
    %666 = arith.mulf %665, %568 : vector<8x8xf32>
    %667 = arith.addf %661, %666 : vector<8x8xf32>
    %cst_267 = arith.constant -2.000000e-01 : f32
    %668 = vector.broadcast %cst_267 : f32 to vector<8x8xf32>
    %669 = arith.subf %401, %668 : vector<8x8xf32>
    %cst_268 = arith.constant 1.250000e+00 : f32
    %670 = vector.broadcast %cst_268 : f32 to vector<8x8xf32>
    %671 = arith.mulf %669, %670 : vector<8x8xf32>
    %672 = arith.mulf %671, %568 : vector<8x8xf32>
    %cst_269 = arith.constant 1.000000e+00 : f32
    %673 = vector.broadcast %cst_269 : f32 to vector<8x8xf32>
    %674 = arith.subf %673, %401 : vector<8x8xf32>
    %cst_270 = arith.constant 1.250000e+00 : f32
    %675 = vector.broadcast %cst_270 : f32 to vector<8x8xf32>
    %676 = arith.mulf %674, %675 : vector<8x8xf32>
    %677 = arith.mulf %676, %579 : vector<8x8xf32>
    %678 = arith.addf %672, %677 : vector<8x8xf32>
    %cst_271 = arith.constant 2.000000e-01 : f32
    %679 = vector.broadcast %cst_271 : f32 to vector<8x8xf32>
    %680 = arith.subf %401, %679 : vector<8x8xf32>
    %cst_272 = arith.constant 1.250000e+00 : f32
    %681 = vector.broadcast %cst_272 : f32 to vector<8x8xf32>
    %682 = arith.mulf %680, %681 : vector<8x8xf32>
    %683 = arith.mulf %682, %579 : vector<8x8xf32>
    %cst_273 = arith.constant 1.400000e+00 : f32
    %684 = vector.broadcast %cst_273 : f32 to vector<8x8xf32>
    %685 = arith.subf %684, %401 : vector<8x8xf32>
    %cst_274 = arith.constant 1.250000e+00 : f32
    %686 = vector.broadcast %cst_274 : f32 to vector<8x8xf32>
    %687 = arith.mulf %685, %686 : vector<8x8xf32>
    %688 = arith.mulf %687, %590 : vector<8x8xf32>
    %689 = arith.addf %683, %688 : vector<8x8xf32>
    %cst_275 = arith.constant 6.000000e-01 : f32
    %690 = vector.broadcast %cst_275 : f32 to vector<8x8xf32>
    %691 = arith.subf %401, %690 : vector<8x8xf32>
    %cst_276 = arith.constant 1.250000e+00 : f32
    %692 = vector.broadcast %cst_276 : f32 to vector<8x8xf32>
    %693 = arith.mulf %691, %692 : vector<8x8xf32>
    %694 = arith.mulf %693, %590 : vector<8x8xf32>
    %cst_277 = arith.constant 1.800000e+00 : f32
    %695 = vector.broadcast %cst_277 : f32 to vector<8x8xf32>
    %696 = arith.subf %695, %401 : vector<8x8xf32>
    %cst_278 = arith.constant 1.250000e+00 : f32
    %697 = vector.broadcast %cst_278 : f32 to vector<8x8xf32>
    %698 = arith.mulf %696, %697 : vector<8x8xf32>
    %699 = arith.mulf %698, %601 : vector<8x8xf32>
    %700 = arith.addf %694, %699 : vector<8x8xf32>
    %cst_279 = arith.constant 1.000000e+00 : f32
    %701 = vector.broadcast %cst_279 : f32 to vector<8x8xf32>
    %702 = arith.subf %401, %701 : vector<8x8xf32>
    %cst_280 = arith.constant 1.250000e+00 : f32
    %703 = vector.broadcast %cst_280 : f32 to vector<8x8xf32>
    %704 = arith.mulf %702, %703 : vector<8x8xf32>
    %705 = arith.mulf %704, %601 : vector<8x8xf32>
    %cst_281 = arith.constant 2.200000e+00 : f32
    %706 = vector.broadcast %cst_281 : f32 to vector<8x8xf32>
    %707 = arith.subf %706, %401 : vector<8x8xf32>
    %cst_282 = arith.constant 1.250000e+00 : f32
    %708 = vector.broadcast %cst_282 : f32 to vector<8x8xf32>
    %709 = arith.mulf %707, %708 : vector<8x8xf32>
    %710 = arith.mulf %709, %612 : vector<8x8xf32>
    %711 = arith.addf %705, %710 : vector<8x8xf32>
    %cst_283 = arith.constant -2.200000e+00 : f32
    %712 = vector.broadcast %cst_283 : f32 to vector<8x8xf32>
    %713 = arith.subf %401, %712 : vector<8x8xf32>
    %cst_284 = arith.constant 0.833333313 : f32
    %714 = vector.broadcast %cst_284 : f32 to vector<8x8xf32>
    %715 = arith.mulf %713, %714 : vector<8x8xf32>
    %716 = arith.mulf %715, %623 : vector<8x8xf32>
    %cst_285 = arith.constant -6.000000e-01 : f32
    %717 = vector.broadcast %cst_285 : f32 to vector<8x8xf32>
    %718 = arith.subf %717, %401 : vector<8x8xf32>
    %cst_286 = arith.constant 0.833333313 : f32
    %719 = vector.broadcast %cst_286 : f32 to vector<8x8xf32>
    %720 = arith.mulf %718, %719 : vector<8x8xf32>
    %721 = arith.mulf %720, %634 : vector<8x8xf32>
    %722 = arith.addf %716, %721 : vector<8x8xf32>
    %cst_287 = arith.constant -1.800000e+00 : f32
    %723 = vector.broadcast %cst_287 : f32 to vector<8x8xf32>
    %724 = arith.subf %401, %723 : vector<8x8xf32>
    %cst_288 = arith.constant 0.833333313 : f32
    %725 = vector.broadcast %cst_288 : f32 to vector<8x8xf32>
    %726 = arith.mulf %724, %725 : vector<8x8xf32>
    %727 = arith.mulf %726, %634 : vector<8x8xf32>
    %cst_289 = arith.constant -2.000000e-01 : f32
    %728 = vector.broadcast %cst_289 : f32 to vector<8x8xf32>
    %729 = arith.subf %728, %401 : vector<8x8xf32>
    %cst_290 = arith.constant 0.833333313 : f32
    %730 = vector.broadcast %cst_290 : f32 to vector<8x8xf32>
    %731 = arith.mulf %729, %730 : vector<8x8xf32>
    %732 = arith.mulf %731, %645 : vector<8x8xf32>
    %733 = arith.addf %727, %732 : vector<8x8xf32>
    %cst_291 = arith.constant -1.400000e+00 : f32
    %734 = vector.broadcast %cst_291 : f32 to vector<8x8xf32>
    %735 = arith.subf %401, %734 : vector<8x8xf32>
    %cst_292 = arith.constant 0.833333313 : f32
    %736 = vector.broadcast %cst_292 : f32 to vector<8x8xf32>
    %737 = arith.mulf %735, %736 : vector<8x8xf32>
    %738 = arith.mulf %737, %645 : vector<8x8xf32>
    %cst_293 = arith.constant 2.000000e-01 : f32
    %739 = vector.broadcast %cst_293 : f32 to vector<8x8xf32>
    %740 = arith.subf %739, %401 : vector<8x8xf32>
    %cst_294 = arith.constant 0.833333313 : f32
    %741 = vector.broadcast %cst_294 : f32 to vector<8x8xf32>
    %742 = arith.mulf %740, %741 : vector<8x8xf32>
    %743 = arith.mulf %742, %656 : vector<8x8xf32>
    %744 = arith.addf %738, %743 : vector<8x8xf32>
    %cst_295 = arith.constant -1.000000e+00 : f32
    %745 = vector.broadcast %cst_295 : f32 to vector<8x8xf32>
    %746 = arith.subf %401, %745 : vector<8x8xf32>
    %cst_296 = arith.constant 0.833333313 : f32
    %747 = vector.broadcast %cst_296 : f32 to vector<8x8xf32>
    %748 = arith.mulf %746, %747 : vector<8x8xf32>
    %749 = arith.mulf %748, %656 : vector<8x8xf32>
    %cst_297 = arith.constant 6.000000e-01 : f32
    %750 = vector.broadcast %cst_297 : f32 to vector<8x8xf32>
    %751 = arith.subf %750, %401 : vector<8x8xf32>
    %cst_298 = arith.constant 0.833333313 : f32
    %752 = vector.broadcast %cst_298 : f32 to vector<8x8xf32>
    %753 = arith.mulf %751, %752 : vector<8x8xf32>
    %754 = arith.mulf %753, %667 : vector<8x8xf32>
    %755 = arith.addf %749, %754 : vector<8x8xf32>
    %cst_299 = arith.constant -6.000000e-01 : f32
    %756 = vector.broadcast %cst_299 : f32 to vector<8x8xf32>
    %757 = arith.subf %401, %756 : vector<8x8xf32>
    %cst_300 = arith.constant 0.833333313 : f32
    %758 = vector.broadcast %cst_300 : f32 to vector<8x8xf32>
    %759 = arith.mulf %757, %758 : vector<8x8xf32>
    %760 = arith.mulf %759, %667 : vector<8x8xf32>
    %cst_301 = arith.constant 1.000000e+00 : f32
    %761 = vector.broadcast %cst_301 : f32 to vector<8x8xf32>
    %762 = arith.subf %761, %401 : vector<8x8xf32>
    %cst_302 = arith.constant 0.833333313 : f32
    %763 = vector.broadcast %cst_302 : f32 to vector<8x8xf32>
    %764 = arith.mulf %762, %763 : vector<8x8xf32>
    %765 = arith.mulf %764, %678 : vector<8x8xf32>
    %766 = arith.addf %760, %765 : vector<8x8xf32>
    %cst_303 = arith.constant -2.000000e-01 : f32
    %767 = vector.broadcast %cst_303 : f32 to vector<8x8xf32>
    %768 = arith.subf %401, %767 : vector<8x8xf32>
    %cst_304 = arith.constant 0.833333313 : f32
    %769 = vector.broadcast %cst_304 : f32 to vector<8x8xf32>
    %770 = arith.mulf %768, %769 : vector<8x8xf32>
    %771 = arith.mulf %770, %678 : vector<8x8xf32>
    %cst_305 = arith.constant 1.400000e+00 : f32
    %772 = vector.broadcast %cst_305 : f32 to vector<8x8xf32>
    %773 = arith.subf %772, %401 : vector<8x8xf32>
    %cst_306 = arith.constant 0.833333313 : f32
    %774 = vector.broadcast %cst_306 : f32 to vector<8x8xf32>
    %775 = arith.mulf %773, %774 : vector<8x8xf32>
    %776 = arith.mulf %775, %689 : vector<8x8xf32>
    %777 = arith.addf %771, %776 : vector<8x8xf32>
    %cst_307 = arith.constant 2.000000e-01 : f32
    %778 = vector.broadcast %cst_307 : f32 to vector<8x8xf32>
    %779 = arith.subf %401, %778 : vector<8x8xf32>
    %cst_308 = arith.constant 0.833333313 : f32
    %780 = vector.broadcast %cst_308 : f32 to vector<8x8xf32>
    %781 = arith.mulf %779, %780 : vector<8x8xf32>
    %782 = arith.mulf %781, %689 : vector<8x8xf32>
    %cst_309 = arith.constant 1.800000e+00 : f32
    %783 = vector.broadcast %cst_309 : f32 to vector<8x8xf32>
    %784 = arith.subf %783, %401 : vector<8x8xf32>
    %cst_310 = arith.constant 0.833333313 : f32
    %785 = vector.broadcast %cst_310 : f32 to vector<8x8xf32>
    %786 = arith.mulf %784, %785 : vector<8x8xf32>
    %787 = arith.mulf %786, %700 : vector<8x8xf32>
    %788 = arith.addf %782, %787 : vector<8x8xf32>
    %cst_311 = arith.constant 6.000000e-01 : f32
    %789 = vector.broadcast %cst_311 : f32 to vector<8x8xf32>
    %790 = arith.subf %401, %789 : vector<8x8xf32>
    %cst_312 = arith.constant 0.833333313 : f32
    %791 = vector.broadcast %cst_312 : f32 to vector<8x8xf32>
    %792 = arith.mulf %790, %791 : vector<8x8xf32>
    %793 = arith.mulf %792, %700 : vector<8x8xf32>
    %cst_313 = arith.constant 2.200000e+00 : f32
    %794 = vector.broadcast %cst_313 : f32 to vector<8x8xf32>
    %795 = arith.subf %794, %401 : vector<8x8xf32>
    %cst_314 = arith.constant 0.833333313 : f32
    %796 = vector.broadcast %cst_314 : f32 to vector<8x8xf32>
    %797 = arith.mulf %795, %796 : vector<8x8xf32>
    %798 = arith.mulf %797, %711 : vector<8x8xf32>
    %799 = arith.addf %793, %798 : vector<8x8xf32>
    %800 = tpu.concatenate %414, %722, %733, %744, %755, %766, %777, %788, %799 in 1 : vector<8x8xf32>, vector<8x8xf32>, vector<8x8xf32>, vector<8x8xf32>, vector<8x8xf32>, vector<8x8xf32>, vector<8x8xf32>, vector<8x8xf32>, vector<8x8xf32> -> vector<8x72xf32>
    %c0_315 = arith.constant 0 : index
    %c0_316 = arith.constant 0 : index
    %801 = vector.load %arg4[%c0_315, %c0_316] : memref<72x8xf32, #tpu.memory_space<vmem>>, vector<72x8xf32>
    %cst_317 = arith.constant dense<0.000000e+00> : vector<8x8xf32>
    %802 = tpu.matmul %800, %801, %cst_317 {dimension_numbers = #tpu.dot_dimension_numbers<[1], [0], [0], [1], [0, 0, 1, 1], [], []>} : vector<8x72xf32>, vector<72x8xf32>, vector<8x8xf32> -> vector<8x8xf32>
    %c0_318 = arith.constant 0 : index
    %c0_319 = arith.constant 0 : index
    %803 = vector.load %arg2[%c0_318, %c0_319] : memref<8x8xf32, #tpu.memory_space<vmem>>, vector<8x8xf32>
    %804 = arith.addf %803, %802 : vector<8x8xf32>
    %c0_320 = arith.constant 0 : index
    %c0_321 = arith.constant 0 : index
    %805 = vector.load %arg5[%c0_320, %c0_321] : memref<8x8xf32, #tpu.memory_space<vmem>>, vector<8x8xf32>
    tpu.vector_store %arg5[%c0_320, %c0_321], %804 {strides = array<i32>} : memref<8x8xf32, #tpu.memory_space<vmem>>, vector<8x8xf32>,
    return
  }
  func.func @transform_0(%arg0: i32) -> (i32, i32) {
    %c0_i32 = arith.constant 0 : i32
    %c0_i32_0 = arith.constant 0 : i32
    return %arg0, %c0_i32 : i32, i32
  }
  func.func @transform_1(%arg0: i32) -> (i32, i32) {
    %c0_i32 = arith.constant 0 : i32
    %c0_i32_0 = arith.constant 0 : i32
    return %arg0, %c0_i32 : i32, i32
  }
  func.func @transform_2(%arg0: i32) -> (i32, i32) {
    %c0_i32 = arith.constant 0 : i32
    %c0_i32_0 = arith.constant 0 : i32
    %c0_i32_1 = arith.constant 0 : i32
    return %c0_i32, %c0_i32_0 : i32, i32
  }
  func.func @transform_3(%arg0: i32) -> (i32, i32) {
    %c0_i32 = arith.constant 0 : i32
    %c0_i32_0 = arith.constant 0 : i32
    %c0_i32_1 = arith.constant 0 : i32
    return %c0_i32, %c0_i32_0 : i32, i32
  }
  func.func @transform_4(%arg0: i32) -> (i32, i32) {
    %c0_i32 = arith.constant 0 : i32
    %c0_i32_0 = arith.constant 0 : i32
    return %arg0, %c0_i32 : i32, i32
  }
}

</mosaic_0001>

<bundles_post_ra>
// kernel: tpu_custom_call.1
= control target key start
LH: loop header
LB: loop body
LE: loop exit
PB: predicated region body
PF: predicated region fallthrough
CT: control target
= control target key end

     0   :  { %v853_v1 = vmov 0.0   ;;  %s1161_s0 = inlined_call_operand.vmem [shape: f32[8,4], index: 0, kind: input, shape index: {}]   ;;  %s1162_s1 = inlined_call_operand.vmem [shape: f32[8,8], index: 1, kind: input, shape index: {}]   ;;  %s1163_s2 = inlined_call_operand.vmem [shape: f32[36,8], index: 2, kind: input, shape index: {}]   ;;  %s1164_s3 = inlined_call_operand.vmem [shape: f32[72,8], index: 3, kind: input, shape index: {}]   ;;  %s1165_s4 = inlined_call_operand.hbm [shape: f32[8,8], index: 4, kind: output, shape index: {}]  }
   0x1   :  { %v897_v0 = vld [vmem:[%s1161_s0] sm:$0xff] }
   0x2   :  { %vm30_vm0 = vcmp.ge.f32.partialorder %v897_v0, -2.2  ;;  %vm31_vm1 = vcmp.lt.f32.partialorder %v897_v0, -1.8  ;;  %vm34_vm2 = vcmp.ge.f32.partialorder %v897_v0, -1.8 }
   0x3   :  { %vm32_vm3 = vmand %vm30_vm0, %vm31_vm1  ;;  %vm35_vm4 = vcmp.lt.f32.partialorder %v897_v0, -1.4  ;;  %vm38_vm5 = vcmp.ge.f32.partialorder %v897_v0, -1.4  ;;  %vm39_vm6 = vcmp.lt.f32.partialorder %v897_v0, -1.0  ;;  %vm42_vm7 = vcmp.ge.f32.partialorder %v897_v0, -1.0 }
   0x4   :  { %v33_v2 = vsel %vm32_vm3, 1.0, %v853_v1  ;;  %vm36_vm8 = vmand %vm34_vm2, %vm35_vm4  ;;  %vm43_vm9 = vcmp.lt.f32.partialorder %v897_v0, -0.6  ;;  %v714_v3 = vadd.f32 2.2, %v897_v0  ;;  %v84_v4 = vsub.f32 -1.0, %v897_v0 }
   0x5   :  { %v37_v5 = vsel %vm36_vm8, 1.0, %v853_v1  ;;  %vm40_vm10 = vmand %vm38_vm5, %vm39_vm6  ;;  %v77_v6 = vsub.f32 -1.4, %v897_v0  ;;  %v913_v7 = vadd.f32 1.8, %v897_v0  ;;  %v916_v8 = vadd.f32 1.0, %v897_v0 }
   0x6   :  { %v41_v9 = vsel %vm40_vm10, 1.0, %v853_v1  ;;  %vm44_vm11 = vmand %vm42_vm7, %vm43_vm9  ;;  %v75_v10 = vmul.f32 2.5, %v714_v3  ;;  %v85_v11 = vmul.f32 2.5, %v84_v4  ;;  %v716_v12 = vadd.f32 1.4, %v897_v0 }
   0x7   :  { %v45_v13 = vsel %vm44_vm11, 1.0, %v853_v1  ;;  %v78_v14 = vmul.f32 2.5, %v77_v6  ;;  %v82_v15 = vmul.f32 2.5, %v913_v7  ;;  %v91_v16 = vsub.f32 -0.6, %v897_v0 }
   0x8   :  { %v76_v17 = vmul.f32 %v75_v10, %v33_v2  ;;  %v86_v18 = vmul.f32 %v85_v11, %v41_v9  ;;  %v89_v19 = vmul.f32 2.5, %v716_v12  ;;  %v144_v20 = vmul.f32 1.25, %v714_v3 }
   0x9   :  { %9 = vsyncpa [#allocation3], 0  ;;  %v79_v21 = vmul.f32 %v78_v14, %v37_v5  ;;  %v83_v22 = vmul.f32 %v82_v15, %v37_v5  ;;  %v92_v23 = vmul.f32 2.5, %v91_v16  ;;  %v146_v24 = vmul.f32 1.25, %v84_v4  ;;  %s854_s0 = smov 4   ;;  %s855_s17 = smov 8  }
   0xa   :  { %v90_v25 = vmul.f32 %v89_v19, %v41_v9  ;;  %v149_v26 = vmul.f32 1.25, %v913_v7  ;;  %v151_v27 = vmul.f32 1.25, %v91_v16  ;;  %v189_v28 = vmul.f32 0.8333333, %v714_v3  ;;  %s856_s18 = smov 12   ;;  %s857_s19 = smov 16  }
   0xb   :  { %v80_v29 = vadd.f32 %v79_v21, %v76_v17  ;;  %v87_v30 = vadd.f32 %v86_v18, %v83_v22  ;;  %v93_v31 = vmul.f32 %v92_v23, %v45_v13  ;;  %v191_v32 = vmul.f32 0.8333333, %v91_v16  ;;  %s858_s20 = smov 20   ;;  %s859_s29 = smov 24  }
   0xc   :  { %vm46_vm12 = vcmp.ge.f32.partialorder %v897_v0, -0.6  ;;  %vm47_vm13 = vcmp.lt.f32.partialorder %v897_v0, -0.2  ;;  %vm50_vm14 = vcmp.ge.f32.partialorder %v897_v0, -0.2 }
   0xd   :  { %v94_v33 = vadd.f32 %v93_v31, %v90_v25  ;;  %v145_v34 = vmul.f32 %v144_v20, %v80_v29  ;;  %v147_v35 = vmul.f32 %v146_v24, %v87_v30  ;;  %v150_v36 = vmul.f32 %v149_v26, %v87_v30  ;;  %vm48_vm15 = vmand %vm46_vm12, %vm47_vm13  ;;  %s862_s30 = smov 28   ;;  %s863_s7 = smov 32  }
   0xe   :  { %v49_v37 = vsel %vm48_vm15, 1.0, %v853_v1  ;;  %vm51_vm0 = vcmp.lt.f32.partialorder %v897_v0, 0.2  ;;  %v96_v38 = vmul.f32 2.5, %v916_v8  ;;  %v98_v39 = vsub.f32 -0.2, %v897_v0 }
   0xf   :  { %v148_v40 = vadd.f32 %v147_v35, %v145_v34  ;;  %v152_v41 = vmul.f32 %v151_v27, %v94_v33  ;;  %vm52_vm1 = vmand %vm50_vm14, %vm51_vm0  ;;  %v932_v42 = vadd.f32 0.6, %v897_v0  ;;  %v105_v43 = vsub.f32 0.2, %v897_v0  ;;  %s864_s15 = smov 40   ;;  %s865_s16 = smov 48  }
  0x10   :  { %v53_v44 = vsel %vm52_vm1, 1.0, %v853_v1  ;;  %v97_v45 = vmul.f32 %v96_v38, %v45_v13  ;;  %v99_v46 = vmul.f32 2.5, %v98_v39  ;;  %v937_v47 = vadd.f32 0.2, %v897_v0  ;;  %s866_s24 = smov 56   ;;  %s867_s25 = smov 64  }
  0x11   :  { %v153_v48 = vadd.f32 %v152_v41, %v150_v36  ;;  %v190_v49 = vmul.f32 %v189_v28, %v148_v40  ;;  %v103_v50 = vmul.f32 2.5, %v932_v42  ;;  %v106_v51 = vmul.f32 2.5, %v105_v43 }
  0x12   :  { %v100_v52 = vmul.f32 %v99_v46, %v49_v37  ;;  %v154_v53 = vmul.f32 1.25, %v716_v12  ;;  %v156_v54 = vmul.f32 1.25, %v98_v39  ;;  %v159_v58 = vmul.f32 1.25, %v916_v8 }
  0x13   :  { %v192_v55 = vmul.f32 %v191_v32, %v153_v48  ;;  %v104_v56 = vmul.f32 %v103_v50, %v49_v37  ;;  %v107_v57 = vmul.f32 %v106_v51, %v53_v44  ;;  %v110_v60 = vmul.f32 2.5, %v937_v47 }
  0x14   :  { %v101_v59 = vadd.f32 %v100_v52, %v97_v45  ;;  %v155_v61 = vmul.f32 %v154_v53, %v94_v33  ;;  %v161_v62 = vmul.f32 1.25, %v105_v43  ;;  %v199_v3 = vmul.f32 0.8333333, %v716_v12 }
  0x15   :  { %v193_v63 = vadd.f32 %v192_v55, %v190_v49  ;;  %v108_v2 = vadd.f32 %v107_v57, %v104_v56  ;;  %v201_v4 = vmul.f32 0.8333333, %v105_v43  ;;  %v194_v9 = vmul.f32 0.8333333, %v913_v7 }
  0x16   :  { %v157_v5 = vmul.f32 %v156_v54, %v101_v59  ;;  %v160_v6 = vmul.f32 %v159_v58, %v101_v59  ;;  %v196_v10 = vmul.f32 0.8333333, %v98_v39  ;;  %vm54_vm2 = vcmp.ge.f32.partialorder %v897_v0, 0.2 }
  0x17   :  { %230 = vrot.lane.b32.xlu0 %v193_v63, %s854_s0  ;;  %v162_v11 = vmul.f32 %v161_v62, %v108_v2  ;;  %vm55_vm3 = vcmp.lt.f32.partialorder %v897_v0, 0.6  ;;  %v112_v13 = vsub.f32 0.6, %v897_v0  ;;  %v111_v14 = vmul.f32 %v110_v60, %v53_v44 }
  0x18   :  { %v158_v15 = vadd.f32 %v157_v5, %v155_v61  ;;  %v195_v16 = vmul.f32 %v194_v9, %v153_v48  ;;  %vm56_vm4 = vmand %vm54_vm2, %vm55_vm3  ;;  %v164_v7 = vmul.f32 1.25, %v932_v42  ;;  %vm58_vm5 = vcmp.ge.f32.partialorder %v897_v0, 0.6 }
  0x19   :  { %v163_v12 = vadd.f32 %v162_v11, %v160_v6  ;;  %v57_v17 = vsel %vm56_vm4, 1.0, %v853_v1  ;;  %v113_v18 = vmul.f32 2.5, %v112_v13  ;;  %v166_v23 = vmul.f32 1.25, %v112_v13 }
  0x1a   :  { %v200_v19 = vmul.f32 %v199_v3, %v158_v15  ;;  %v197_v20 = vmul.f32 %v196_v10, %v158_v15  ;;  %vm59_vm6 = vcmp.lt.f32.partialorder %v897_v0, 1.0  ;;  %v951_v25 = vadd.f32 -0.2, %v897_v0 }
  0x1b   :  { %v202_v21 = vmul.f32 %v201_v4, %v163_v12  ;;  %v114_v22 = vmul.f32 %v113_v18, %v57_v17  ;;  %v119_v26 = vsub.f32 1.0, %v897_v0  ;;  %v165_v29 = vmul.f32 %v164_v7, %v108_v2  ;;  %vm60_vm7 = vmand %vm58_vm5, %vm59_vm6 }
  0x1c   :  { %v198_v24 = vadd.f32 %v197_v20, %v195_v16  ;;  %v204_v30 = vmul.f32 0.8333333, %v916_v8  ;;  %v61_v31 = vsel %vm60_vm7, 1.0, %v853_v1  ;;  %v117_v32 = vmul.f32 2.5, %v951_v25 }
  0x1d   :  { %v203_v27 = vadd.f32 %v202_v21, %v200_v19  ;;  %v115_v28 = vadd.f32 %v114_v22, %v111_v14  ;;  %v120_v33 = vmul.f32 2.5, %v119_v26  ;;  %v169_v34 = vmul.f32 1.25, %v937_v47 }
  0x1e   :  { %234 = vrot.lane.b32.xlu0 %v198_v24, %s855_s17  ;;  %v206_v36 = vmul.f32 0.8333333, %v112_v13  ;;  %v171_v37 = vmul.f32 1.25, %v119_v26  ;;  %vm62_vm8 = vcmp.ge.f32.partialorder %v897_v0, 1.0  ;;  %v118_v38 = vmul.f32 %v117_v32, %v57_v17 }
  0x1f   :  { %238 = vrot.lane.b32.xlu1 %v203_v27, %s856_s18  ;;  %v167_v35 = vmul.f32 %v166_v23, %v115_v28  ;;  %v121_v8 = vmul.f32 %v120_v33, %v61_v31  ;;  %vm63_vm9 = vcmp.lt.f32.partialorder %v897_v0, 1.4  ;;  %v962_v39 = vadd.f32 -0.6, %v897_v0 }
  0x20   :  { %v205_v41 = vmul.f32 %v204_v30, %v163_v12  ;;  %v209_v43 = vmul.f32 0.8333333, %v932_v42  ;;  %vm64_vm10 = vmand %vm62_vm8, %vm63_vm9  ;;  %v126_v44 = vsub.f32 1.4, %v897_v0  ;;  %v170_v46 = vmul.f32 %v169_v34, %v115_v28  ;;  %v278_v30 = vld [vmem:[%s1163_s2 + $0x8] sm:$0xff] }
  0x21   :  { %v168_v40 = vadd.f32 %v167_v35, %v165_v29  ;;  %v122_v45 = vadd.f32 %v121_v8, %v118_v38  ;;  %v65_v48 = vsel %vm64_vm10, 1.0, %v853_v1  ;;  %v124_v49 = vmul.f32 2.5, %v962_v39 }
  0x22   :  { %v127_v51 = vmul.f32 2.5, %v126_v44  ;;  %v174_v52 = vmul.f32 1.25, %v951_v25  ;;  %vm66_vm11 = vcmp.ge.f32.partialorder %v897_v0, 1.4  ;;  %v211_v54 = vmul.f32 0.8333333, %v119_v26 }
  0x23   :  { %v207_v50 = vmul.f32 %v206_v36, %v168_v40  ;;  %v172_v53 = vmul.f32 %v171_v37, %v122_v45  ;;  %v125_v55 = vmul.f32 %v124_v49, %v61_v31  ;;  %v176_v56 = vmul.f32 1.25, %v126_v44  ;;  %v279_v36 = vld [vmem:[%s1163_s2 + $0x10] sm:$0xff]  ;;  %v280_v37 = vld [vmem:[%s1163_s2 + $0x18] sm:$0xff] }
  0x24   :  { %v128_v57 = vmul.f32 %v127_v51, %v65_v48  ;;  %vm67_vm12 = vcmp.lt.f32.partialorder %v897_v0, 1.8  ;;  %v722_v58 = vadd.f32 -1.0, %v897_v0  ;;  %v210_v60 = vmul.f32 %v209_v43, %v168_v40 }
  0x25   :  { %v208_v42 = vadd.f32 %v207_v50, %v205_v41  ;;  %v173_v59 = vadd.f32 %v172_v53, %v170_v46  ;;  %v214_v61 = vmul.f32 0.8333333, %v937_v47  ;;  %vm68_vm13 = vmand %vm66_vm11, %vm67_vm12  ;;  %v133_v62 = vsub.f32 1.8, %v897_v0 }
  0x26   :  { %v129_v63 = vadd.f32 %v128_v57, %v125_v55  ;;  %v175_v2 = vmul.f32 %v174_v52, %v122_v45  ;;  %v69_v3 = vsel %vm68_vm13, 1.0, %v853_v1  ;;  %v131_v4 = vmul.f32 2.5, %v722_v58  ;;  %v281_v52 = vld [vmem:[%s1163_s2 + $0x20] sm:$0xf] }
  0x27   :  { %242 = vrot.lane.b32.xlu1 %v208_v42, %s857_s19  ;;  %v212_v5 = vmul.f32 %v211_v54, %v173_v59  ;;  %v134_v6 = vmul.f32 2.5, %v133_v62  ;;  %v179_v9 = vmul.f32 1.25, %v962_v39  ;;  %vm70_vm14 = vcmp.ge.f32.partialorder %v897_v0, 1.8 }
  0x28   :  { %v177_v10 = vmul.f32 %v176_v56, %v129_v63  ;;  %v216_v11 = vmul.f32 0.8333333, %v126_v44  ;;  %v132_v47 = vmul.f32 %v131_v4, %v65_v48  ;;  %v181_v13 = vmul.f32 1.25, %v133_v62 }
  0x29   :  { %v213_v14 = vadd.f32 %v212_v5, %v210_v60  ;;  %v135_v15 = vmul.f32 %v134_v6, %v69_v3  ;;  %vm71_vm15 = vcmp.lt.f32.partialorder %v897_v0, 2.2  ;;  %v723_v16 = vadd.f32 -1.4, %v897_v0 }
  0x2a   :  { %v178_v12 = vadd.f32 %v177_v10, %v175_v2  ;;  %v215_v17 = vmul.f32 %v214_v61, %v173_v59  ;;  %v219_v18 = vmul.f32 0.8333333, %v951_v25  ;;  %vm72_vm0 = vmand %vm70_vm14, %vm71_vm15  ;;  %v140_v7 = vsub.f32 2.2, %v897_v0  ;;  %v277_v25 = vld [vmem:[%s1163_s2] sm:$0xff] }
  0x2b   :  { %246 = vrot.lane.b32.xlu0 %v213_v14, %s858_s20  ;;  %v136_v19 = vadd.f32 %v135_v15, %v132_v47  ;;  %v180_v20 = vmul.f32 %v179_v9, %v129_v63  ;;  %v73_v21 = vsel %vm72_vm0, 1.0, %v853_v1  ;;  %v138_v22 = vmul.f32 2.5, %v723_v16 }
  0x2c   :  { %v217_v23 = vmul.f32 %v216_v11, %v178_v12  ;;  %v141_v24 = vmul.f32 2.5, %v140_v7  ;;  %v184_v26 = vmul.f32 1.25, %v722_v58  ;;  %v221_v28 = vmul.f32 0.8333333, %v133_v62 }
  0x2d   :  { %v182_v27 = vmul.f32 %v181_v13, %v136_v19  ;;  %v139_v29 = vmul.f32 %v138_v22, %v69_v3  ;;  %v186_v33 = vmul.f32 1.25, %v140_v7  ;;  %v220_v35 = vmul.f32 %v219_v18, %v178_v12  ;;  %v614_v12 = vld [vmem:[%s1164_s3] sm:$0xff] }
  0x2e   :  { %v218_v31 = vadd.f32 %v217_v23, %v215_v17  ;;  %v142_v32 = vmul.f32 %v141_v24, %v73_v21  ;;  %v185_v8 = vmul.f32 %v184_v26, %v136_v19  ;;  %v224_v40 = vmul.f32 0.8333333, %v962_v39  ;;  %v615_v17 = vld [vmem:[%s1164_s3 + $0x8] sm:$0xff] }
  0x2f   :  { %v183_v34 = vadd.f32 %v182_v27, %v180_v20  ;;  %v860_v41 = vmov 0.0|0.0   ;;  %v788_v43 = vpack.c.bf16 %v278_v30, %v277_v25  ;;  %v226_v46 = vmul.f32 0.8333333, %v140_v7 }
  0x30   :  { %250 = vrot.lane.b32.xlu1 %v218_v31, %s859_s29  ;;  %v143_v38 = vadd.f32 %v142_v32, %v139_v29  ;;  %787 = vmatprep.subr.bf16.mxu0 %v860_v41  ;;  %v791_v48 = vpack.c.bf16 %v280_v37, %v279_v36  ;;  %vm861_vm1 = vmmov 0   ;;  %vm286_vm2 = vcmask 1043456  }
  0x31   :  { %v222_v44 = vmul.f32 %v221_v28, %v183_v34  ;;  %793 = vmatprep.subr.bf16.mxu1 %v860_v41  ;;  %789 = vmatpush3.bf16.msra.mxu0 %v788_v43  ;;  %v225_v51 = vmul.f32 %v224_v40, %v183_v34  ;;  %v19_v54 = vand.u32 2147483647, %v897_v0  ;;  %vm26_vm3 = vcmp.ge.f32.partialorder %v897_v0, 0.0 }
  0x32   :  { %v187_v45 = vmul.f32 %v186_v33, %v143_v38  ;;  %790 = vmatprep.subr.bf16.mxu0 %v860_v41  ;;  %763 = vmatprep.mubr.msk.f32.mxu0 %vm861_vm1, %v853_v1  ;;  %vm261_vm4 = vcmask 31744   ;;  %vm263_vm5 = vcmask 64512   ;;  %vm265_vm6 = vcmask 97280  }
  0x33   :  { %v223_v49 = vadd.f32 %v222_v44, %v220_v35  ;;  %784 = vmatprep.mubr.msk.f32.mxu1 %vm861_vm1, %v853_v1  ;;  %v20_v55 = vsub.f32 0.0, %v19_v54  ;;  %vm267_vm7 = vcmask 130048   ;;  %vm269_vm8 = vcmask 162816  }
  0x34   :  { %v188_v50 = vadd.f32 %v187_v45, %v185_v8  ;;  %vm271_vm9 = vcmask 195584   ;;  %vm273_vm10 = vcmask 228352   ;;  %vm275_vm11 = vcmask 261120  }
  0x35   :  { %254 = vrot.lane.b32.xlu0 %v223_v49, %s862_s30  ;;  %792 = vmatpush3.bf16.msra.mxu0 %v791_v48  ;;  %v21_v56 = vmul.f32 1.442695, %v20_v55  ;;  %vm282_vm12 = vcmask 293888   ;;  %v794_v18 = vpack.c.bf16 %v615_v17, %v614_v12 }
  0x36   :  { %v227_v39 = vmul.f32 %v226_v46, %v188_v50  ;;  %761 = vmatprep.subr.mxu0 %v853_v1 }
  0x37   :  { %821 = vpow2.f32 %v21_v56  ;;  %795 = vmatpush3.bf16.msra.mxu1 %v794_v18 }
  0x38   :  { %v228_v53 = vadd.f32 %v227_v39, %v225_v51  ;;  %796 = vmatprep.subr.bf16.mxu1 %v860_v41 }
  0x39   :  { %762 = vmatpush3.msk.msra.mxu0 %vm286_vm2, %v281_v52 }
  0x3a   :  { %258 = vrot.lane.b32.xlu1 %v228_v53, %s863_s7 }
  0x41   :  { %v822_v42 = vpop.eup %821 }
  0x42   :  { %v23_v57 = vadd.f32 1.0, %v822_v42 }
  0x44   :  { %823 = vrcp.f32 %v23_v57 }
  0x4e   :  { %v824_v58 = vpop.eup %823 }
  0x4f   :  { %v27_v59 = vmul.f32 %v824_v58, %v822_v42 }
  0x51   :  { %v28_v61 = vsel %vm26_vm3, %v824_v58, %v27_v59 }
  0x52   :  { %v29_v62 = vmul.f32 %v28_v61, %v897_v0 }
  0x89   :  { %v231_v60 = vpop.permute.xlu0 %230 }
  0x8a   :  { %v262_v3 = vsel %vm261_vm4, %v29_v62, %v231_v60 }
  0x90   :  { %v235_v2 = vpop.permute.xlu0 %234 }
  0x91   :  { %v239_v63 = vpop.permute.xlu1 %238  ;;  %v264_v4 = vsel %vm263_vm5, %v262_v3, %v235_v2 }
  0x92   :  { %v266_v6 = vsel %vm265_vm6, %v264_v4, %v239_v63 }
  0x99   :  { %v243_v5 = vpop.permute.xlu1 %242 }
  0x9a   :  { %v268_v10 = vsel %vm267_vm7, %v266_v6, %v243_v5 }
  0x9d   :  { %v247_v9 = vpop.permute.xlu0 %246 }
  0x9e   :  { %v270_v11 = vsel %vm269_vm8, %v268_v10, %v247_v9 }
  0xa2   :  { %v251_v47 = vpop.permute.xlu1 %250 }
  0xa3   :  { %v272_v13 = vsel %vm271_vm9, %v270_v11, %v251_v47 }
  0xa7   :  { %v255_v0 = vpop.permute.xlu0 %254 }
  0xa8   :  { %v274_v14 = vsel %vm273_vm10, %v272_v13, %v255_v0 }
  0xac   :  { %v259_v15 = vpop.permute.xlu1 %258 }
  0xad   :  { %v276_v16 = vsel %vm275_vm11, %v274_v14, %v259_v15 }
  0xae   :  { %764 = vmatmul.mubr.msk.f32.vlgmr.msra.gmra.mrb[0].mxu0 %vm282_vm12, %v276_v16 }
 0x181   :  { %v1021_v7 = vpop.f32.mrb[0].mxu0 }
 0x182   :  { %v765_v19 = vpop.f32.mrb[1].mxu0  ;;  %vm375_vm13 = vcmp.ge.f32.partialorder %v1021_v7, -1.8  ;;  %vm376_vm14 = vcmp.lt.f32.partialorder %v1021_v7, -1.4  ;;  %vm380_vm15 = vcmp.lt.f32.partialorder %v1021_v7, -1.0 }
 0x183   :  { %vm377_vm0 = vmand %vm375_vm13, %vm376_vm14  ;;  %vm379_vm1 = vcmp.ge.f32.partialorder %v1021_v7, -1.4  ;;  %vm383_vm2 = vcmp.ge.f32.partialorder %v1021_v7, -1.0  ;;  %vm384_vm3 = vcmp.lt.f32.partialorder %v1021_v7, -0.6  ;;  %v425_v20 = vsub.f32 -1.0, %v1021_v7 }
 0x184   :  { %v378_v21 = vsel %vm377_vm0, 1.0, %v853_v1  ;;  %vm381_vm4 = vmand %vm379_vm1, %vm380_vm15  ;;  %vm387_vm6 = vcmp.ge.f32.partialorder %v1021_v7, -0.6  ;;  %vm388_vm8 = vcmp.lt.f32.partialorder %v1021_v7, -0.2  ;;  %v1034_v22 = vadd.f32 1.0, %v1021_v7 }
 0x185   :  { %v382_v23 = vsel %vm381_vm4, 1.0, %v853_v1  ;;  %vm385_vm10 = vmand %vm383_vm2, %vm384_vm3  ;;  %v727_v24 = vadd.f32 1.8, %v1021_v7  ;;  %v426_v26 = vmul.f32 2.5, %v425_v20  ;;  %v1039_v27 = vadd.f32 1.4, %v1021_v7 }
 0x186   :  { %v386_v28 = vsel %vm385_vm10, 1.0, %v853_v1  ;;  %vm389_vm12 = vmand %vm387_vm6, %vm388_vm8  ;;  %v432_v29 = vsub.f32 -0.6, %v1021_v7  ;;  %v437_v25 = vmul.f32 2.5, %v1034_v22  ;;  %v439_v30 = vsub.f32 -0.2, %v1021_v7 }
 0x187   :  { %v1046_v31 = vsel %vm389_vm12, 1.0, %v853_v1  ;;  %v423_v32 = vmul.f32 2.5, %v727_v24  ;;  %v427_v33 = vmul.f32 %v426_v26, %v382_v23  ;;  %v430_v34 = vmul.f32 2.5, %v1039_v27 }
 0x188   :  { %v433_v35 = vmul.f32 2.5, %v432_v29  ;;  %v438_v36 = vmul.f32 %v437_v25, %v386_v28  ;;  %v440_v37 = vmul.f32 2.5, %v439_v30  ;;  %v490_v38 = vmul.f32 1.25, %v727_v24 }
 0x189   :  { %v424_v8 = vmul.f32 %v423_v32, %v378_v21  ;;  %v431_v40 = vmul.f32 %v430_v34, %v382_v23  ;;  %v492_v43 = vmul.f32 1.25, %v432_v29  ;;  %v495_v44 = vmul.f32 1.25, %v1039_v27 }
 0x18a   :  { %v434_v45 = vmul.f32 %v433_v35, %v386_v28  ;;  %v441_v46 = vmul.f32 %v440_v37, %v1046_v31  ;;  %v497_v48 = vmul.f32 1.25, %v439_v30  ;;  %v535_v49 = vmul.f32 0.8333333, %v727_v24 }
 0x18b   :  { %v428_v50 = vadd.f32 %v427_v33, %v424_v8  ;;  %v537_v51 = vmul.f32 0.8333333, %v439_v30  ;;  %vm371_vm13 = vcmp.ge.f32.partialorder %v1021_v7, -2.2  ;;  %vm372_vm14 = vcmp.lt.f32.partialorder %v1021_v7, -1.8 }
 0x18c   :  { %v435_v39 = vadd.f32 %v434_v45, %v431_v40  ;;  %v442_v52 = vadd.f32 %v441_v46, %v438_v36  ;;  %vm373_vm15 = vmand %vm371_vm13, %vm372_vm14  ;;  %v726_v53 = vadd.f32 2.2, %v1021_v7  ;;  %v418_v54 = vsub.f32 -1.4, %v1021_v7 }
 0x18d   :  { %v491_v55 = vmul.f32 %v490_v38, %v428_v50  ;;  %v374_v56 = vsel %vm373_vm15, 1.0, %v853_v1  ;;  %v487_v42 = vmul.f32 1.25, %v425_v20  ;;  %v532_v57 = vmul.f32 0.8333333, %v432_v29 }
 0x18e   :  { %v493_v58 = vmul.f32 %v492_v43, %v435_v39  ;;  %v496_v59 = vmul.f32 %v495_v44, %v435_v39  ;;  %v498_v60 = vmul.f32 %v497_v48, %v442_v52  ;;  %v416_v61 = vmul.f32 2.5, %v726_v53 }
 0x18f   :  { %v419_v62 = vmul.f32 2.5, %v418_v54  ;;  %v485_v63 = vmul.f32 1.25, %v726_v53  ;;  %v488_v2 = vmul.f32 %v487_v42, %v428_v50  ;;  %v530_v3 = vmul.f32 0.8333333, %v726_v53 }
 0x190   :  { %v494_v4 = vadd.f32 %v493_v58, %v491_v55  ;;  %v499_v5 = vadd.f32 %v498_v60, %v496_v59  ;;  %v417_v6 = vmul.f32 %v416_v61, %v374_v56  ;;  %vm391_vm0 = vcmp.ge.f32.partialorder %v1021_v7, -0.2 }
 0x191   :  { %v420_v9 = vmul.f32 %v419_v62, %v378_v21  ;;  %vm392_vm1 = vcmp.lt.f32.partialorder %v1021_v7, 0.2  ;;  %vm395_vm2 = vcmp.ge.f32.partialorder %v1021_v7, 0.2  ;;  %vm396_vm3 = vcmp.lt.f32.partialorder %v1021_v7, 0.6 }
 0x192   :  { %v536_v10 = vmul.f32 %v535_v49, %v494_v4  ;;  %v538_v11 = vmul.f32 %v537_v51, %v499_v5  ;;  %v533_v47 = vmul.f32 %v532_v57, %v494_v4  ;;  %vm393_vm4 = vmand %vm391_vm0, %vm392_vm1  ;;  %v1061_v0 = vadd.f32 0.6, %v1021_v7 }
 0x193   :  { %v421_v13 = vadd.f32 %v420_v9, %v417_v6  ;;  %v394_v14 = vsel %vm393_vm4, 1.0, %v853_v1  ;;  %vm397_vm6 = vmand %vm395_vm2, %vm396_vm3  ;;  %v446_v15 = vsub.f32 0.2, %v1021_v7  ;;  %v1066_v16 = vadd.f32 0.2, %v1021_v7 }
 0x194   :  { %v539_v12 = vadd.f32 %v538_v11, %v536_v10  ;;  %v398_v17 = vsel %vm397_vm6, 1.0, %v853_v1  ;;  %v444_v18 = vmul.f32 2.5, %v1061_v0  ;;  %v453_v19 = vsub.f32 0.6, %v1021_v7 }
 0x195   :  { %v486_v20 = vmul.f32 %v485_v63, %v421_v13  ;;  %v447_v21 = vmul.f32 2.5, %v446_v15  ;;  %v451_v23 = vmul.f32 2.5, %v1066_v16  ;;  %v500_v24 = vmul.f32 1.25, %v1034_v22 }
 0x196   :  { %575 = vrot.lane.b32.xlu1 %v539_v12, %s857_s19  ;;  %v445_v26 = vmul.f32 %v444_v18, %v1046_v31  ;;  %v454_v28 = vmul.f32 2.5, %v453_v19  ;;  %v502_v29 = vmul.f32 1.25, %v446_v15  ;;  %v505_v25 = vmul.f32 1.25, %v1061_v0 }
 0x197   :  { %v489_v30 = vadd.f32 %v488_v2, %v486_v20  ;;  %v448_v32 = vmul.f32 %v447_v21, %v394_v14  ;;  %v452_v33 = vmul.f32 %v451_v23, %v394_v14  ;;  %v501_v34 = vmul.f32 %v500_v24, %v442_v52 }
 0x198   :  { %v455_v35 = vmul.f32 %v454_v28, %v398_v17  ;;  %v507_v36 = vmul.f32 1.25, %v453_v19  ;;  %v545_v37 = vmul.f32 0.8333333, %v1034_v22  ;;  %v547_v38 = vmul.f32 0.8333333, %v453_v19 }
 0x199   :  { %v531_v8 = vmul.f32 %v530_v3, %v489_v30  ;;  %v449_v40 = vadd.f32 %v448_v32, %v445_v26  ;;  %v540_v43 = vmul.f32 0.8333333, %v1039_v27  ;;  %v542_v44 = vmul.f32 0.8333333, %v446_v15 }
 0x19a   :  { %v456_v45 = vadd.f32 %v455_v35, %v452_v33  ;;  %vm399_vm8 = vcmp.ge.f32.partialorder %v1021_v7, 0.6  ;;  %vm400_vm10 = vcmp.lt.f32.partialorder %v1021_v7, 1.0  ;;  %vm403_vm12 = vcmp.ge.f32.partialorder %v1021_v7, 1.0 }
 0x19b   :  { %v534_v31 = vadd.f32 %v533_v47, %v531_v8  ;;  %v503_v46 = vmul.f32 %v502_v29, %v449_v40  ;;  %v506_v48 = vmul.f32 %v505_v25, %v449_v40  ;;  %v541_v49 = vmul.f32 %v540_v43, %v499_v5  ;;  %vm401_vm13 = vmand %vm399_vm8, %vm400_vm10 }
 0x19c   :  { %v508_v50 = vmul.f32 %v507_v36, %v456_v45  ;;  %v402_v22 = vsel %vm401_vm13, 1.0, %v853_v1  ;;  %vm404_vm14 = vcmp.lt.f32.partialorder %v1021_v7, 1.4  ;;  %v1084_v27 = vadd.f32 -0.2, %v1021_v7 }
 0x19d   :  { %571 = vrot.lane.b32.xlu0 %v534_v31, %s855_s17  ;;  %v504_v51 = vadd.f32 %v503_v46, %v501_v34  ;;  %vm405_vm15 = vmand %vm403_vm12, %vm404_vm14  ;;  %v460_v39 = vsub.f32 1.0, %v1021_v7  ;;  %v1089_v52 = vadd.f32 -0.6, %v1021_v7  ;;  %v467_v53 = vsub.f32 1.4, %v1021_v7 }
 0x19e   :  { %v509_v54 = vadd.f32 %v508_v50, %v506_v48  ;;  %v406_v55 = vsel %vm405_vm15, 1.0, %v853_v1  ;;  %v458_v56 = vmul.f32 2.5, %v1084_v27  ;;  %v510_v42 = vmul.f32 1.25, %v1066_v16  ;;  %v616_v48 = vld [vmem:[%s1164_s3 + $0x10] sm:$0xff] }
 0x19f   :  { %v546_v57 = vmul.f32 %v545_v37, %v504_v51  ;;  %v543_v58 = vmul.f32 %v542_v44, %v504_v51  ;;  %v461_v59 = vmul.f32 2.5, %v460_v39  ;;  %v465_v60 = vmul.f32 2.5, %v1089_v52 }
 0x1a0   :  { %v548_v61 = vmul.f32 %v547_v38, %v509_v54  ;;  %v459_v62 = vmul.f32 %v458_v56, %v398_v17  ;;  %v468_v63 = vmul.f32 2.5, %v467_v53  ;;  %v511_v5 = vmul.f32 %v510_v42, %v456_v45  ;;  %v619_v56 = vld [vmem:[%s1164_s3 + $0x28] sm:$0xff] }
 0x1a1   :  { %v544_v2 = vadd.f32 %v543_v58, %v541_v49  ;;  %v462_v3 = vmul.f32 %v461_v59, %v402_v22  ;;  %v466_v4 = vmul.f32 %v465_v60, %v402_v22  ;;  %v512_v10 = vmul.f32 1.25, %v460_v39  ;;  %v617_v49 = vld [vmem:[%s1164_s3 + $0x18] sm:$0xff] }
 0x1a2   :  { %v549_v6 = vadd.f32 %v548_v61, %v546_v57  ;;  %v469_v9 = vmul.f32 %v468_v63, %v406_v55  ;;  %v515_v11 = vmul.f32 1.25, %v1084_v27  ;;  %v517_v13 = vmul.f32 1.25, %v467_v53 }
 0x1a3   :  { %579 = vrot.lane.b32.xlu0 %v544_v2, %s859_s29  ;;  %v463_v47 = vadd.f32 %v462_v3, %v459_v62  ;;  %v555_v14 = vmul.f32 0.8333333, %v1066_v16  ;;  %v557_v15 = vmul.f32 0.8333333, %v467_v53  ;;  %v550_v17 = vmul.f32 0.8333333, %v1061_v0 }
 0x1a4   :  { %583 = vrot.lane.b32.xlu1 %v549_v6, %s863_s7  ;;  %v470_v12 = vadd.f32 %v469_v9, %v466_v4  ;;  %vm407_vm0 = vcmp.ge.f32.partialorder %v1021_v7, 1.4  ;;  %vm408_vm1 = vcmp.lt.f32.partialorder %v1021_v7, 1.8  ;;  %v552_v20 = vmul.f32 0.8333333, %v460_v39 }
 0x1a5   :  { %v513_v18 = vmul.f32 %v512_v10, %v463_v47  ;;  %v516_v19 = vmul.f32 %v515_v11, %v463_v47  ;;  %vm409_vm2 = vmand %vm407_vm0, %vm408_vm1  ;;  %vm411_vm3 = vcmp.ge.f32.partialorder %v1021_v7, 1.8  ;;  %v551_v23 = vmul.f32 %v550_v17, %v509_v54  ;;  %v620_v6 = vld [vmem:[%s1164_s3 + $0x30] sm:$0xff]  ;;  %s868_s29 = smov [#allocation2]  }
 0x1a6   :  { %v518_v21 = vmul.f32 %v517_v13, %v470_v12  ;;  %vm412_vm4 = vcmp.lt.f32.partialorder %v1021_v7, 2.2  ;;  %v734_v16 = vadd.f32 -1.0, %v1021_v7  ;;  %v474_v0 = vsub.f32 1.8, %v1021_v7  ;;  %s706_s30 = sshll.u32 %s868_s29, 4  ;;  %s707_s30 = int_to_ptr.vmem [resolvable:$true] %s706_s30 }
 0x1a7   :  { %v514_v24 = vadd.f32 %v513_v18, %v511_v5  ;;  %vm413_vm6 = vmand %vm411_vm3, %vm412_vm4  ;;  %v735_v26 = vadd.f32 -1.4, %v1021_v7  ;;  %v481_v28 = vsub.f32 2.2, %v1021_v7  ;;  %v410_v25 = vsel %vm409_vm2, 1.0, %v853_v1  ;;  %s829_s5 = scalar_lea.vmem %s707_s30, 128  ;;  %p834_p1 = scmp.lt.s32.totalorder %s707_s30, %s707_s30 }
 0x1a8   :  { %v519_v29 = vadd.f32 %v518_v21, %v516_v19  ;;  %v414_v30 = vsel %vm413_vm6, 1.0, %v853_v1  ;;  %v472_v32 = vmul.f32 2.5, %v734_v16  ;;  %v475_v35 = vmul.f32 2.5, %v474_v0  ;;  %p830_p0 = scmp.ne.s32.totalorder %s707_s30, %s829_s5  ;;  %p835_p2 = scmp.lt.s32.totalorder %s829_s5, %s829_s5 }
 0x1a9   :  { %v556_v33 = vmul.f32 %v555_v14, %v514_v24  ;;  %v553_v34 = vmul.f32 %v552_v20, %v514_v24  ;;  %v479_v36 = vmul.f32 2.5, %v735_v26  ;;  %v482_v8 = vmul.f32 2.5, %v481_v28  ;;  %v622_v14 = vld [vmem:[%s1164_s3 + $0x40] sm:$0xff] }
 0x1aa   :  { %v558_v37 = vmul.f32 %v557_v15, %v519_v29  ;;  %v473_v38 = vmul.f32 %v472_v32, %v406_v55  ;;  %v476_v43 = vmul.f32 %v475_v35, %v410_v25  ;;  %v520_v45 = vmul.f32 1.25, %v1089_v52  ;;  %v618_v55 = vld [vmem:[%s1164_s3 + $0x20] sm:$0xff]  ;;  %p836_p3 = por %p835_p2, %p834_p1 }
 0x1ab   :  { %v554_v40 = vadd.f32 %v553_v34, %v551_v23  ;;  %v480_v44 = vmul.f32 %v479_v36, %v410_v25  ;;  %v483_v46 = vmul.f32 %v482_v8, %v414_v30  ;;  %v522_v51 = vmul.f32 1.25, %v474_v0 }
 0x1ac   :  { %v559_v31 = vadd.f32 %v558_v37, %v556_v33  ;;  %v477_v50 = vadd.f32 %v476_v43, %v473_v38  ;;  %v521_v22 = vmul.f32 %v520_v45, %v470_v12  ;;  %v525_v39 = vmul.f32 1.25, %v734_v16  ;;  %v697_v38 = vld [vmem:[%s1162_s1] sm:$0xff]  ;;  %p837_p4 = pnand %p836_p3, %p830_p0 }
 0x1ad   :  { %587 = vrot.lane.b32.xlu0 %v554_v40, %s864_s15  ;;  %v484_v53 = vadd.f32 %v483_v46, %v480_v44  ;;  %v527_v54 = vmul.f32 1.25, %v481_v28  ;;  %v560_v58 = vmul.f32 0.8333333, %v1084_v27  ;;  %v797_v59 = vpack.c.bf16 %v617_v49, %v616_v48  ;;  %v621_v27 = vld [vmem:[%s1164_s3 + $0x38] sm:$0xff] }
 0x1ae   :  { %591 = vrot.lane.b32.xlu1 %v559_v31, %s865_s16  ;;  %v523_v42 = vmul.f32 %v522_v51, %v477_v50  ;;  %v526_v57 = vmul.f32 %v525_v39, %v477_v50  ;;  %v565_v61 = vmul.f32 0.8333333, %v1089_v52  ;;  %v562_v2 = vmul.f32 0.8333333, %v474_v0 }
 0x1af   :  { %v528_v60 = vmul.f32 %v527_v54, %v484_v53  ;;  %v561_v63 = vmul.f32 %v560_v58, %v519_v29  ;;  %798 = vmatpush3.bf16.msra.mxu1 %v797_v59  ;;  %v800_v3 = vpack.c.bf16 %v619_v56, %v618_v55  ;;  %v567_v5 = vmul.f32 0.8333333, %v481_v28 }
 0x1b0   :  { %v524_v62 = vadd.f32 %v523_v42, %v521_v22  ;;  %799 = vmatprep.subr.bf16.mxu1 %v860_v41  ;;  %v803_v47 = vpack.c.bf16 %v621_v27, %v620_v6  ;;  %v360_v15 = vand.u32 2147483647, %v1021_v7  ;;  %vm367_vm8 = vcmp.ge.f32.partialorder %v1021_v7, 0.0 }
 0x1b1   :  { %v529_v4 = vadd.f32 %v528_v60, %v526_v57  ;;  %vm606_vm10 = vcmask 326656   ;;  %vm608_vm12 = vcmask 392192   ;;  %vm610_vm13 = vcmask 457728  }
 0x1b2   :  { %v566_v9 = vmul.f32 %v565_v61, %v524_v62  ;;  %v563_v10 = vmul.f32 %v562_v2, %v524_v62  ;;  %v361_v12 = vsub.f32 0.0, %v360_v15  ;;  %vm612_vm14 = vcmask 523264  }
 0x1b3   :  { %v568_v52 = vmul.f32 %v567_v5, %v529_v4  ;;  %801 = vmatpush3.bf16.msra.mxu1 %v800_v3  ;;  %vm623_vm15 = vcmask 588800  }
 0x1b4   :  { %v564_v11 = vadd.f32 %v563_v10, %v561_v63  ;;  %802 = vmatprep.subr.bf16.mxu1 %v860_v41  ;;  %v362_v17 = vmul.f32 1.442695, %v361_v12 }
 0x1b5   :  { %v569_v13 = vadd.f32 %v568_v52, %v566_v9 }
 0x1b6   :  { %595 = vrot.lane.b32.xlu0 %v564_v11, %s866_s24  ;;  %825 = vpow2.f32 %v362_v17 }
 0x1b7   :  { %599 = vrot.lane.b32.xlu1 %v569_v13, %s867_s25  ;;  %804 = vmatpush3.bf16.msra.mxu1 %v803_v47 }
 0x1b8   :  { %782 = vmatprep.subr.mxu1 %v853_v1 }
 0x1bb   :  { %783 = vmatpush3.msra.mxu1 %v622_v14 }
 0x1c0   :  { %v826_v18 = vpop.eup %825 }
 0x1c1   :  { %v364_v19 = vadd.f32 1.0, %v826_v18 }
 0x1c3   :  { %827 = vrcp.f32 %v364_v19 }
 0x1cd   :  { %v828_v41 = vpop.eup %827 }
 0x1ce   :  { %v368_v20 = vmul.f32 %v828_v41, %v826_v18 }
 0x1d0   :  { %v369_v1 = vsel %vm367_vm8, %v828_v41, %v368_v20 }
 0x1d1   :  { %v370_v16 = vmul.f32 %v369_v1, %v1021_v7 }
 0x208   :  { %v576_v23 = vpop.permute.xlu1 %575 }
 0x20f   :  { %v572_v21 = vpop.permute.xlu0 %571 }
 0x210   :  { %v602_v0 = vsel %vm263_vm5, %v370_v16, %v572_v21 }
 0x211   :  { %v603_v28 = vsel %vm267_vm7, %v602_v0, %v576_v23 }
 0x215   :  { %v580_v24 = vpop.permute.xlu0 %579 }
 0x216   :  { %v584_v26 = vpop.permute.xlu1 %583  ;;  %v604_v29 = vsel %vm271_vm9, %v603_v28, %v580_v24 }
 0x217   :  { %v605_v32 = vsel %vm275_vm11, %v604_v29, %v584_v26 }
 0x21f   :  { %v588_v25 = vpop.permute.xlu0 %587 }
 0x220   :  { %v592_v30 = vpop.permute.xlu1 %591  ;;  %v607_v33 = vsel %vm606_vm10, %v605_v32, %v588_v25 }
 0x221   :  { %v609_v35 = vsel %vm608_vm12, %v607_v33, %v592_v30 }
 0x228   :  { %v596_v34 = vpop.permute.xlu0 %595 }
 0x229   :  { %v600_v7 = vpop.permute.xlu1 %599  ;;  %v611_v36 = vsel %vm610_vm13, %v609_v35, %v596_v34 }
 0x22a   :  { %v613_v37 = vsel %vm612_vm14, %v611_v36, %v600_v7 }
 0x22b   :  { %785 = vmatmul.mubr.msk.f32.vlgmr.msra.gmra.mrb[0].mxu1 %vm623_vm15, %v613_v37 }
 0x2fe   :  { %v693_v8 = vpop.f32.mrb[0].mxu1 }
 0x2ff   :  { %v698_v40 = vadd.f32 %v697_v38, %v693_v8  ;;  %v786_v43 = vpop.f32.mrb[1].mxu1 }
 0x301   :  { %699 = vst.msk [vmem:[#allocation2] sm:$0xff] %vm263_vm5, %v698_v40 }
 0x302   :  { %840 = shalt.err (!%p837_p4)
}
 0x303   :  { %s841_s2 = scalar_lea.hbm %s1165_s4, 128 }
 0x304   :  { %p842_p5 = scmp.ne.s32.totalorder %s1165_s4, %s841_s2  ;;  %p845_p6 = scmp.lt.u32.totalorder %s841_s2, %s1165_s4 }
 0x306   :  { %p847_p7 = pnand %p845_p6, %p842_p5 }
 0x308   :  { %850 = shalt.err (!%p847_p7)
}
 0x309   :  { %709 = dma.vmem_to_hbm [thread:$0]  %s707_s30, 128, %s1165_s4, [#allocation3]  }
 0x30a   :  { %851 = dma.done.wait [#allocation3], 128  }
 0x30b   :  { %852 = vsyncadd [#allocation3], 4294967168 }
 0x30c   :  { %713 = vsyncpa [#allocation3], 1 }

</bundles_post_ra>
